<compile_context>
chip_gen: v7x
topology: tpu7x:2x2x1
jax: 0.10.0
libtpu: 0.0.40
codegen_flags: <defaults>
</compile_context>

<pallas_src>
import jax
import jax.numpy as jnp
from jax import lax
from jax.experimental import pallas as pl
from jax.experimental.pallas import tpu as pltpu

FEATURE_DIM = 128
C_IN, C_OUT = 3, 32
K = 3
H = W = 16
HW = H * W                 # 256 spatial positions
POOL = 4                   # AdaptiveAvgPool2d((4,4)) on 16x16 -> mean over 4x4 blocks
NP = POOL * POOL           # 16 pooled positions == 16 within-block positions
K_RAW = C_IN * K * K       # 27
K_PAD = 32                 # im2col contraction dim padded 27 -> 32 with zero taps
MAX_BATCH_TILE = 128


def _round_up(x, m):
    return ((x + m - 1) // m) * m


# ---------------------------------------------------------------------------
# Fused Pallas kernel: conv -> bias/ReLU -> avg-pool -> flatten -> linear
# ---------------------------------------------------------------------------
def fused_cnn_kernel(pt_ref, wc_ref, bc_ref, wl_ref, bl_ref, out_ref):
    """Per grid step (batch tile of `bt` images):

    pt_ref  : (32, bt*256) bf16  im2col patches; lane = q*(16*bt) + p*bt + b
                                 (q = within-pool-block index, p = pool block, b = image)
    wc_ref  : (32, 32)     bf16  conv weight (c_out, k), zero-padded in k
    bc_ref  : (32, 1)      f32   conv bias
    wl_ref  : (16, 128, 32) f32  linear weight regrouped: wl[p, f, c] = wf[f, c*16+p]
    bl_ref  : (1, 128)     f32   linear bias
    out_ref : (bt, 128)    f32   final features (lane-dense)
    """
    bt = out_ref.shape[0]

    # ---- conv: ONE wide MXU matmul (bf16 operands, f32 accumulate), bias + ReLU
    conv = jnp.dot(wc_ref[...], pt_ref[...],
                   preferred_element_type=jnp.float32)            # (32, bt*256)
    conv = jnp.maximum(conv + bc_ref[...], 0.0)

    # ---- adaptive avg pool: lanes are q-major, so pooling is a sum of 16 aligned
    #      lane-slices of width bt*16 (pure VPU adds, no MXU, no relayout)
    w16 = bt * NP
    pooled = conv[:, :w16]
    for q in range(1, NP):
        pooled = pooled + conv[:, q * w16:(q + 1) * w16]
    pooled = pooled * (1.0 / NP)                                   # (32, bt*16), lane = p*bt + b

    # ---- linear, folded per pool position p: acc[f, b] += wl[p] (128,32) @ pooled_p (32, bt)
    acc = jnp.dot(wl_ref[0], pooled[:, :bt],
                  preferred_element_type=jnp.float32)              # (128, bt)
    for p in range(1, NP):
        acc = acc + jnp.dot(wl_ref[p], pooled[:, p * bt:(p + 1) * bt],
                            preferred_element_type=jnp.float32)

    # ---- (128, bt) -> (bt, 128) transpose on the MXU via identity NT matmul (cheap: bt rows)
    eye = (lax.broadcasted_iota(jnp.int32, (bt, bt), 0)
           == lax.broadcasted_iota(jnp.int32, (bt, bt), 1)).astype(jnp.float32)
    feats = lax.dot_general(eye, acc, (((1,), (1,)), ((), ())),
                            preferred_element_type=jnp.float32)    # (bt, 128)

    out_ref[...] = feats + bl_ref[...]


# ---------------------------------------------------------------------------
# Glue: q-major im2col layout, operand prep, wrapper
# ---------------------------------------------------------------------------
def _build_patches(x_bf16, ntiles, bt):
    """x (npad,3,16,16) bf16 -> pt (32, npad*256) bf16.

    Lane index within a bt-image tile is q*(16*bt) + p*bt + b with
    p = (h//4)*4 + (w//4) (pool block) and q = (h%4)*4 + (w%4) (within block)."""
    npad = ntiles * bt
    xp = jnp.pad(x_bf16, ((0, 0), (0, 0), (1, 1), (1, 1)))
    taps = [xp[:, ci, dh:dh + H, dw:dw + W]
            for ci in range(C_IN) for dh in range(K) for dw in range(K)]   # 27 x (npad,16,16)
    taps += [jnp.zeros_like(taps[0])] * (K_PAD - K_RAW)                    # fold k-pad 27->32
    t = jnp.stack(taps, axis=0)                                            # (32, npad, 16, 16)
    t = t.reshape(K_PAD, ntiles, bt, POOL, POOL, POOL, POOL)               # (k,tile,b,hb,hq,wb,wq)
    t = t.transpose(0, 1, 4, 6, 3, 5, 2)                                   # (k,tile,hq,wq,hb,wb,b)
    return t.reshape(K_PAD, npad * HW)


def simple_cnn_forward(x, wc, bc, wf, bf, *, batch_tile=MAX_BATCH_TILE):
    """x: (N, 3, 16, 16) NCHW float32.  Params in PyTorch conventions:
    wc:(32,3,3,3) bc:(32,) wf:(128,512) bf:(128,).  Returns (N, 128) float32."""
    n = x.shape[0]
    # keep >= 2 grid steps once there is enough work so both v7x TensorCores engage;
    # bt saturates at 128 for large N (one compile per large-N shape family).
    bt = int(min(batch_tile, max(8, _round_up(-(-n // 2), 8))))
    npad = _round_up(n, bt)
    ntiles = npad // bt

    xq = jnp.pad(x.astype(jnp.bfloat16),
                 ((0, npad - n), (0, 0), (0, 0), (0, 0)))
    pt = _build_patches(xq, ntiles, bt)                                    # (32, npad*256) bf16

    wc_mat = jnp.pad(wc.reshape(C_OUT, K_RAW),
                     ((0, 0), (0, K_PAD - K_RAW))).astype(jnp.bfloat16)    # (32, 32) bf16
    bc2 = bc.reshape(C_OUT, 1).astype(jnp.float32)
    wl3 = wf.reshape(FEATURE_DIM, C_OUT, NP).transpose(2, 0, 1).astype(jnp.float32)  # (16,128,32)
    bl = bf.reshape(1, FEATURE_DIM).astype(jnp.float32)

    flops = ntiles * (2 * C_OUT * K_PAD * bt * HW        # conv
                      + 2 * NP * FEATURE_DIM * C_OUT * bt  # folded linear
                      + 2 * bt * bt * FEATURE_DIM)          # MXU transpose
    bytes_accessed = (2 * (pt.size + wc_mat.size)
                      + 4 * (bc2.size + wl3.size + bl.size + npad * FEATURE_DIM))

    out = pl.pallas_call(
        fused_cnn_kernel,
        out_shape=jax.ShapeDtypeStruct((npad, FEATURE_DIM), jnp.float32),
        grid=(ntiles,),
        in_specs=[
            pl.BlockSpec((K_PAD, bt * HW), lambda i: (0, i)),
            pl.BlockSpec((C_OUT, K_PAD), lambda i: (0, 0)),
            pl.BlockSpec((C_OUT, 1), lambda i: (0, 0)),
            pl.BlockSpec((NP, FEATURE_DIM, C_OUT), lambda i: (0, 0, 0)),
            pl.BlockSpec((1, FEATURE_DIM), lambda i: (0, 0)),
        ],
        out_specs=pl.BlockSpec((bt, FEATURE_DIM), lambda i: (i, 0)),
        compiler_params=pltpu.CompilerParams(
            dimension_semantics=("parallel",),
            vmem_limit_bytes=32 * 1024 * 1024),
        cost_estimate=pl.CostEstimate(flops=flops, transcendentals=0,
                                      bytes_accessed=bytes_accessed),
    )(pt, wc_mat, bc2, wl3, bl)
    return out[:n]


# ---------------------------------------------------------------------------
# Pure-JAX reference (correctness check)
# ---------------------------------------------------------------------------
def reference_forward(x, wc, bc, wf, bf):
    conv = jax.lax.conv_general_dilated(
        x, wc, window_strides=(1, 1), padding=((1, 1), (1, 1)),
        dimension_numbers=("NCHW", "OIHW", "NCHW"))
    conv = jax.nn.relu(conv + bc[None, :, None, None])
    n, c, h, w = conv.shape
    pooled = conv.reshape(n, c, POOL, h // POOL, POOL, w // POOL).mean(axis=(3, 5))
    flat = pooled.reshape(n, -1)                                           # (N, 32*4*4)
    return flat @ wf.T + bf


if __name__ == "__main__":
    key = jax.random.PRNGKey(0)
    kx, kwc, kbc, kwf, kbf = jax.random.split(key, 5)

    # deterministic parameters (PyTorch shape conventions)
    wc = jax.random.normal(kwc, (C_OUT, C_IN, K, K), dtype=jnp.float32) * 0.1
    bc = jax.random.normal(kbc, (C_OUT,), dtype=jnp.float32) * 0.1
    wf = jax.random.normal(kwf, (FEATURE_DIM, C_OUT * NP), dtype=jnp.float32) * 0.05
    bf = jax.random.normal(kbf, (FEATURE_DIM,), dtype=jnp.float32) * 0.05

    fwd = jax.jit(simple_cnn_forward)

    # n=2: small batch; n=37: exercises batch padding and a multi-step (2-tile) grid.
    for n in (2, 37):
        x = jax.random.normal(jax.random.fold_in(kx, n), (n, C_IN, H, W), dtype=jnp.float32)
        out = jax.block_until_ready(fwd(x, wc, bc, wf, bf))
        ref = jax.block_until_ready(reference_forward(x, wc, bc, wf, bf))
        assert out.shape == (n, FEATURE_DIM), out.shape
        max_err = float(jnp.max(jnp.abs(out - ref)))
        # tolerance accounts for bf16 patches / conv weights (f32 accumulation everywhere)
        assert jnp.allclose(out, ref, atol=2e-3, rtol=2e-3), (n, max_err)

    print("KERNEL_OK")
</pallas_src>

<mosaic_0001>
module attributes {stable_mosaic.version = 11 : i64} {
  func.func @fused_cnn_kernel(%arg0: i32, %arg1: memref<32x2048xbf16, #tpu.memory_space<vmem>>, %arg2: memref<32x32xbf16, #tpu.memory_space<vmem>>, %arg3: memref<32x1xf32, #tpu.memory_space<vmem>>, %arg4: memref<16x128x32xf32, #tpu.memory_space<vmem>>, %arg5: memref<1x128xf32, #tpu.memory_space<vmem>>, %arg6: memref<8x128xf32, #tpu.memory_space<vmem>>) attributes {dimension_semantics = [#tpu.dimension_semantics<parallel>], iteration_bounds = array<i64: 1>, scalar_prefetch = 0 : i64, scratch_operands = 0 : i64, tpu.core_type = #tpu.core_type<tc>, window_params = [{transform_indices = @transform_0, window_bounds = array<i64: 32, 2048>}, {pipeline_mode = #tpu.pipeline_mode<synchronous>, transform_indices = @transform_1, window_bounds = array<i64: 32, 32>}, {pipeline_mode = #tpu.pipeline_mode<synchronous>, transform_indices = @transform_2, window_bounds = array<i64: 32, 1>}, {pipeline_mode = #tpu.pipeline_mode<synchronous>, transform_indices = @transform_3, window_bounds = array<i64: 16, 128, 32>}, {pipeline_mode = #tpu.pipeline_mode<synchronous>, transform_indices = @transform_4, window_bounds = array<i64: 1, 128>}, {transform_indices = @transform_5, window_bounds = array<i64: 8, 128>}]} {
    %c0 = arith.constant 0 : index
    %c0_0 = arith.constant 0 : index
    %0 = vector.load %arg2[%c0, %c0_0] : memref<32x32xbf16, #tpu.memory_space<vmem>>, vector<32x32xbf16>
    %c0_1 = arith.constant 0 : index
    %c0_2 = arith.constant 0 : index
    %1 = vector.load %arg1[%c0_1, %c0_2] : memref<32x2048xbf16, #tpu.memory_space<vmem>>, vector<32x2048xbf16>
    %cst = arith.constant dense<0.000000e+00> : vector<32x2048xf32>
    %2 = tpu.matmul %0, %1, %cst {dimension_numbers = #tpu.dot_dimension_numbers<[1], [0], [0], [1], [0, 0, 1, 1], [], []>} : vector<32x32xbf16>, vector<32x2048xbf16>, vector<32x2048xf32> -> vector<32x2048xf32>
    %c0_3 = arith.constant 0 : index
    %c0_4 = arith.constant 0 : index
    %3 = vector.load %arg3[%c0_3, %c0_4] : memref<32x1xf32, #tpu.memory_space<vmem>>, vector<32x1xf32>
    %4 = vector.broadcast %3 : vector<32x1xf32> to vector<32x2048xf32>
    %5 = arith.addf %2, %4 : vector<32x2048xf32>
    %cst_5 = arith.constant 0.000000e+00 : f32
    %6 = vector.broadcast %cst_5 : f32 to vector<32x2048xf32>
    %7 = arith.maximumf %5, %6 : vector<32x2048xf32>
    %8 = vector.extract_strided_slice %7 {offsets = [0, 0], sizes = [32, 128], strides = [1, 1]} : vector<32x2048xf32> to vector<32x128xf32>
    %9 = vector.extract_strided_slice %7 {offsets = [0, 128], sizes = [32, 128], strides = [1, 1]} : vector<32x2048xf32> to vector<32x128xf32>
    %10 = arith.addf %8, %9 : vector<32x128xf32>
    %11 = vector.extract_strided_slice %7 {offsets = [0, 256], sizes = [32, 128], strides = [1, 1]} : vector<32x2048xf32> to vector<32x128xf32>
    %12 = arith.addf %10, %11 : vector<32x128xf32>
    %13 = vector.extract_strided_slice %7 {offsets = [0, 384], sizes = [32, 128], strides = [1, 1]} : vector<32x2048xf32> to vector<32x128xf32>
    %14 = arith.addf %12, %13 : vector<32x128xf32>
    %15 = vector.extract_strided_slice %7 {offsets = [0, 512], sizes = [32, 128], strides = [1, 1]} : vector<32x2048xf32> to vector<32x128xf32>
    %16 = arith.addf %14, %15 : vector<32x128xf32>
    %17 = vector.extract_strided_slice %7 {offsets = [0, 640], sizes = [32, 128], strides = [1, 1]} : vector<32x2048xf32> to vector<32x128xf32>
    %18 = arith.addf %16, %17 : vector<32x128xf32>
    %19 = vector.extract_strided_slice %7 {offsets = [0, 768], sizes = [32, 128], strides = [1, 1]} : vector<32x2048xf32> to vector<32x128xf32>
    %20 = arith.addf %18, %19 : vector<32x128xf32>
    %21 = vector.extract_strided_slice %7 {offsets = [0, 896], sizes = [32, 128], strides = [1, 1]} : vector<32x2048xf32> to vector<32x128xf32>
    %22 = arith.addf %20, %21 : vector<32x128xf32>
    %23 = vector.extract_strided_slice %7 {offsets = [0, 1024], sizes = [32, 128], strides = [1, 1]} : vector<32x2048xf32> to vector<32x128xf32>
    %24 = arith.addf %22, %23 : vector<32x128xf32>
    %25 = vector.extract_strided_slice %7 {offsets = [0, 1152], sizes = [32, 128], strides = [1, 1]} : vector<32x2048xf32> to vector<32x128xf32>
    %26 = arith.addf %24, %25 : vector<32x128xf32>
    %27 = vector.extract_strided_slice %7 {offsets = [0, 1280], sizes = [32, 128], strides = [1, 1]} : vector<32x2048xf32> to vector<32x128xf32>
    %28 = arith.addf %26, %27 : vector<32x128xf32>
    %29 = vector.extract_strided_slice %7 {offsets = [0, 1408], sizes = [32, 128], strides = [1, 1]} : vector<32x2048xf32> to vector<32x128xf32>
    %30 = arith.addf %28, %29 : vector<32x128xf32>
    %31 = vector.extract_strided_slice %7 {offsets = [0, 1536], sizes = [32, 128], strides = [1, 1]} : vector<32x2048xf32> to vector<32x128xf32>
    %32 = arith.addf %30, %31 : vector<32x128xf32>
    %33 = vector.extract_strided_slice %7 {offsets = [0, 1664], sizes = [32, 128], strides = [1, 1]} : vector<32x2048xf32> to vector<32x128xf32>
    %34 = arith.addf %32, %33 : vector<32x128xf32>
    %35 = vector.extract_strided_slice %7 {offsets = [0, 1792], sizes = [32, 128], strides = [1, 1]} : vector<32x2048xf32> to vector<32x128xf32>
    %36 = arith.addf %34, %35 : vector<32x128xf32>
    %37 = vector.extract_strided_slice %7 {offsets = [0, 1920], sizes = [32, 128], strides = [1, 1]} : vector<32x2048xf32> to vector<32x128xf32>
    %38 = arith.addf %36, %37 : vector<32x128xf32>
    %cst_6 = arith.constant 6.250000e-02 : f32
    %39 = vector.broadcast %cst_6 : f32 to vector<32x128xf32>
    %40 = arith.mulf %38, %39 : vector<32x128xf32>
    %c0_7 = arith.constant 0 : index
    %c0_8 = arith.constant 0 : index
    %c0_9 = arith.constant 0 : index
    %41 = vector.load %arg4[%c0_7, %c0_8, %c0_9] : memref<16x128x32xf32, #tpu.memory_space<vmem>>, vector<1x128x32xf32>
    %42 = vector.shape_cast %41 : vector<1x128x32xf32> to vector<128x32xf32>
    %43 = vector.extract_strided_slice %40 {offsets = [0, 0], sizes = [32, 8], strides = [1, 1]} : vector<32x128xf32> to vector<32x8xf32>
    %cst_10 = arith.constant dense<0.000000e+00> : vector<128x8xf32>
    %44 = tpu.matmul %42, %43, %cst_10 {dimension_numbers = #tpu.dot_dimension_numbers<[1], [0], [0], [1], [0, 0, 1, 1], [], []>} : vector<128x32xf32>, vector<32x8xf32>, vector<128x8xf32> -> vector<128x8xf32>
    %c1 = arith.constant 1 : index
    %c0_11 = arith.constant 0 : index
    %c0_12 = arith.constant 0 : index
    %45 = vector.load %arg4[%c1, %c0_11, %c0_12] : memref<16x128x32xf32, #tpu.memory_space<vmem>>, vector<1x128x32xf32>
    %46 = vector.shape_cast %45 : vector<1x128x32xf32> to vector<128x32xf32>
    %47 = vector.extract_strided_slice %40 {offsets = [0, 8], sizes = [32, 8], strides = [1, 1]} : vector<32x128xf32> to vector<32x8xf32>
    %cst_13 = arith.constant dense<0.000000e+00> : vector<128x8xf32>
    %48 = tpu.matmul %46, %47, %cst_13 {dimension_numbers = #tpu.dot_dimension_numbers<[1], [0], [0], [1], [0, 0, 1, 1], [], []>} : vector<128x32xf32>, vector<32x8xf32>, vector<128x8xf32> -> vector<128x8xf32>
    %49 = arith.addf %44, %48 : vector<128x8xf32>
    %c2 = arith.constant 2 : index
    %c0_14 = arith.constant 0 : index
    %c0_15 = arith.constant 0 : index
    %50 = vector.load %arg4[%c2, %c0_14, %c0_15] : memref<16x128x32xf32, #tpu.memory_space<vmem>>, vector<1x128x32xf32>
    %51 = vector.shape_cast %50 : vector<1x128x32xf32> to vector<128x32xf32>
    %52 = vector.extract_strided_slice %40 {offsets = [0, 16], sizes = [32, 8], strides = [1, 1]} : vector<32x128xf32> to vector<32x8xf32>
    %cst_16 = arith.constant dense<0.000000e+00> : vector<128x8xf32>
    %53 = tpu.matmul %51, %52, %cst_16 {dimension_numbers = #tpu.dot_dimension_numbers<[1], [0], [0], [1], [0, 0, 1, 1], [], []>} : vector<128x32xf32>, vector<32x8xf32>, vector<128x8xf32> -> vector<128x8xf32>
    %54 = arith.addf %49, %53 : vector<128x8xf32>
    %c3 = arith.constant 3 : index
    %c0_17 = arith.constant 0 : index
    %c0_18 = arith.constant 0 : index
    %55 = vector.load %arg4[%c3, %c0_17, %c0_18] : memref<16x128x32xf32, #tpu.memory_space<vmem>>, vector<1x128x32xf32>
    %56 = vector.shape_cast %55 : vector<1x128x32xf32> to vector<128x32xf32>
    %57 = vector.extract_strided_slice %40 {offsets = [0, 24], sizes = [32, 8], strides = [1, 1]} : vector<32x128xf32> to vector<32x8xf32>
    %cst_19 = arith.constant dense<0.000000e+00> : vector<128x8xf32>
    %58 = tpu.matmul %56, %57, %cst_19 {dimension_numbers = #tpu.dot_dimension_numbers<[1], [0], [0], [1], [0, 0, 1, 1], [], []>} : vector<128x32xf32>, vector<32x8xf32>, vector<128x8xf32> -> vector<128x8xf32>
    %59 = arith.addf %54, %58 : vector<128x8xf32>
    %c4 = arith.constant 4 : index
    %c0_20 = arith.constant 0 : index
    %c0_21 = arith.constant 0 : index
    %60 = vector.load %arg4[%c4, %c0_20, %c0_21] : memref<16x128x32xf32, #tpu.memory_space<vmem>>, vector<1x128x32xf32>
    %61 = vector.shape_cast %60 : vector<1x128x32xf32> to vector<128x32xf32>
    %62 = vector.extract_strided_slice %40 {offsets = [0, 32], sizes = [32, 8], strides = [1, 1]} : vector<32x128xf32> to vector<32x8xf32>
    %cst_22 = arith.constant dense<0.000000e+00> : vector<128x8xf32>
    %63 = tpu.matmul %61, %62, %cst_22 {dimension_numbers = #tpu.dot_dimension_numbers<[1], [0], [0], [1], [0, 0, 1, 1], [], []>} : vector<128x32xf32>, vector<32x8xf32>, vector<128x8xf32> -> vector<128x8xf32>
    %64 = arith.addf %59, %63 : vector<128x8xf32>
    %c5 = arith.constant 5 : index
    %c0_23 = arith.constant 0 : index
    %c0_24 = arith.constant 0 : index
    %65 = vector.load %arg4[%c5, %c0_23, %c0_24] : memref<16x128x32xf32, #tpu.memory_space<vmem>>, vector<1x128x32xf32>
    %66 = vector.shape_cast %65 : vector<1x128x32xf32> to vector<128x32xf32>
    %67 = vector.extract_strided_slice %40 {offsets = [0, 40], sizes = [32, 8], strides = [1, 1]} : vector<32x128xf32> to vector<32x8xf32>
    %cst_25 = arith.constant dense<0.000000e+00> : vector<128x8xf32>
    %68 = tpu.matmul %66, %67, %cst_25 {dimension_numbers = #tpu.dot_dimension_numbers<[1], [0], [0], [1], [0, 0, 1, 1], [], []>} : vector<128x32xf32>, vector<32x8xf32>, vector<128x8xf32> -> vector<128x8xf32>
    %69 = arith.addf %64, %68 : vector<128x8xf32>
    %c6 = arith.constant 6 : index
    %c0_26 = arith.constant 0 : index
    %c0_27 = arith.constant 0 : index
    %70 = vector.load %arg4[%c6, %c0_26, %c0_27] : memref<16x128x32xf32, #tpu.memory_space<vmem>>, vector<1x128x32xf32>
    %71 = vector.shape_cast %70 : vector<1x128x32xf32> to vector<128x32xf32>
    %72 = vector.extract_strided_slice %40 {offsets = [0, 48], sizes = [32, 8], strides = [1, 1]} : vector<32x128xf32> to vector<32x8xf32>
    %cst_28 = arith.constant dense<0.000000e+00> : vector<128x8xf32>
    %73 = tpu.matmul %71, %72, %cst_28 {dimension_numbers = #tpu.dot_dimension_numbers<[1], [0], [0], [1], [0, 0, 1, 1], [], []>} : vector<128x32xf32>, vector<32x8xf32>, vector<128x8xf32> -> vector<128x8xf32>
    %74 = arith.addf %69, %73 : vector<128x8xf32>
    %c7 = arith.constant 7 : index
    %c0_29 = arith.constant 0 : index
    %c0_30 = arith.constant 0 : index
    %75 = vector.load %arg4[%c7, %c0_29, %c0_30] : memref<16x128x32xf32, #tpu.memory_space<vmem>>, vector<1x128x32xf32>
    %76 = vector.shape_cast %75 : vector<1x128x32xf32> to vector<128x32xf32>
    %77 = vector.extract_strided_slice %40 {offsets = [0, 56], sizes = [32, 8], strides = [1, 1]} : vector<32x128xf32> to vector<32x8xf32>
    %cst_31 = arith.constant dense<0.000000e+00> : vector<128x8xf32>
    %78 = tpu.matmul %76, %77, %cst_31 {dimension_numbers = #tpu.dot_dimension_numbers<[1], [0], [0], [1], [0, 0, 1, 1], [], []>} : vector<128x32xf32>, vector<32x8xf32>, vector<128x8xf32> -> vector<128x8xf32>
    %79 = arith.addf %74, %78 : vector<128x8xf32>
    %c8 = arith.constant 8 : index
    %c0_32 = arith.constant 0 : index
    %c0_33 = arith.constant 0 : index
    %80 = vector.load %arg4[%c8, %c0_32, %c0_33] : memref<16x128x32xf32, #tpu.memory_space<vmem>>, vector<1x128x32xf32>
    %81 = vector.shape_cast %80 : vector<1x128x32xf32> to vector<128x32xf32>
    %82 = vector.extract_strided_slice %40 {offsets = [0, 64], sizes = [32, 8], strides = [1, 1]} : vector<32x128xf32> to vector<32x8xf32>
    %cst_34 = arith.constant dense<0.000000e+00> : vector<128x8xf32>
    %83 = tpu.matmul %81, %82, %cst_34 {dimension_numbers = #tpu.dot_dimension_numbers<[1], [0], [0], [1], [0, 0, 1, 1], [], []>} : vector<128x32xf32>, vector<32x8xf32>, vector<128x8xf32> -> vector<128x8xf32>
    %84 = arith.addf %79, %83 : vector<128x8xf32>
    %c9 = arith.constant 9 : index
    %c0_35 = arith.constant 0 : index
    %c0_36 = arith.constant 0 : index
    %85 = vector.load %arg4[%c9, %c0_35, %c0_36] : memref<16x128x32xf32, #tpu.memory_space<vmem>>, vector<1x128x32xf32>
    %86 = vector.shape_cast %85 : vector<1x128x32xf32> to vector<128x32xf32>
    %87 = vector.extract_strided_slice %40 {offsets = [0, 72], sizes = [32, 8], strides = [1, 1]} : vector<32x128xf32> to vector<32x8xf32>
    %cst_37 = arith.constant dense<0.000000e+00> : vector<128x8xf32>
    %88 = tpu.matmul %86, %87, %cst_37 {dimension_numbers = #tpu.dot_dimension_numbers<[1], [0], [0], [1], [0, 0, 1, 1], [], []>} : vector<128x32xf32>, vector<32x8xf32>, vector<128x8xf32> -> vector<128x8xf32>
    %89 = arith.addf %84, %88 : vector<128x8xf32>
    %c10 = arith.constant 10 : index
    %c0_38 = arith.constant 0 : index
    %c0_39 = arith.constant 0 : index
    %90 = vector.load %arg4[%c10, %c0_38, %c0_39] : memref<16x128x32xf32, #tpu.memory_space<vmem>>, vector<1x128x32xf32>
    %91 = vector.shape_cast %90 : vector<1x128x32xf32> to vector<128x32xf32>
    %92 = vector.extract_strided_slice %40 {offsets = [0, 80], sizes = [32, 8], strides = [1, 1]} : vector<32x128xf32> to vector<32x8xf32>
    %cst_40 = arith.constant dense<0.000000e+00> : vector<128x8xf32>
    %93 = tpu.matmul %91, %92, %cst_40 {dimension_numbers = #tpu.dot_dimension_numbers<[1], [0], [0], [1], [0, 0, 1, 1], [], []>} : vector<128x32xf32>, vector<32x8xf32>, vector<128x8xf32> -> vector<128x8xf32>
    %94 = arith.addf %89, %93 : vector<128x8xf32>
    %c11 = arith.constant 11 : index
    %c0_41 = arith.constant 0 : index
    %c0_42 = arith.constant 0 : index
    %95 = vector.load %arg4[%c11, %c0_41, %c0_42] : memref<16x128x32xf32, #tpu.memory_space<vmem>>, vector<1x128x32xf32>
    %96 = vector.shape_cast %95 : vector<1x128x32xf32> to vector<128x32xf32>
    %97 = vector.extract_strided_slice %40 {offsets = [0, 88], sizes = [32, 8], strides = [1, 1]} : vector<32x128xf32> to vector<32x8xf32>
    %cst_43 = arith.constant dense<0.000000e+00> : vector<128x8xf32>
    %98 = tpu.matmul %96, %97, %cst_43 {dimension_numbers = #tpu.dot_dimension_numbers<[1], [0], [0], [1], [0, 0, 1, 1], [], []>} : vector<128x32xf32>, vector<32x8xf32>, vector<128x8xf32> -> vector<128x8xf32>
    %99 = arith.addf %94, %98 : vector<128x8xf32>
    %c12 = arith.constant 12 : index
    %c0_44 = arith.constant 0 : index
    %c0_45 = arith.constant 0 : index
    %100 = vector.load %arg4[%c12, %c0_44, %c0_45] : memref<16x128x32xf32, #tpu.memory_space<vmem>>, vector<1x128x32xf32>
    %101 = vector.shape_cast %100 : vector<1x128x32xf32> to vector<128x32xf32>
    %102 = vector.extract_strided_slice %40 {offsets = [0, 96], sizes = [32, 8], strides = [1, 1]} : vector<32x128xf32> to vector<32x8xf32>
    %cst_46 = arith.constant dense<0.000000e+00> : vector<128x8xf32>
    %103 = tpu.matmul %101, %102, %cst_46 {dimension_numbers = #tpu.dot_dimension_numbers<[1], [0], [0], [1], [0, 0, 1, 1], [], []>} : vector<128x32xf32>, vector<32x8xf32>, vector<128x8xf32> -> vector<128x8xf32>
    %104 = arith.addf %99, %103 : vector<128x8xf32>
    %c13 = arith.constant 13 : index
    %c0_47 = arith.constant 0 : index
    %c0_48 = arith.constant 0 : index
    %105 = vector.load %arg4[%c13, %c0_47, %c0_48] : memref<16x128x32xf32, #tpu.memory_space<vmem>>, vector<1x128x32xf32>
    %106 = vector.shape_cast %105 : vector<1x128x32xf32> to vector<128x32xf32>
    %107 = vector.extract_strided_slice %40 {offsets = [0, 104], sizes = [32, 8], strides = [1, 1]} : vector<32x128xf32> to vector<32x8xf32>
    %cst_49 = arith.constant dense<0.000000e+00> : vector<128x8xf32>
    %108 = tpu.matmul %106, %107, %cst_49 {dimension_numbers = #tpu.dot_dimension_numbers<[1], [0], [0], [1], [0, 0, 1, 1], [], []>} : vector<128x32xf32>, vector<32x8xf32>, vector<128x8xf32> -> vector<128x8xf32>
    %109 = arith.addf %104, %108 : vector<128x8xf32>
    %c14 = arith.constant 14 : index
    %c0_50 = arith.constant 0 : index
    %c0_51 = arith.constant 0 : index
    %110 = vector.load %arg4[%c14, %c0_50, %c0_51] : memref<16x128x32xf32, #tpu.memory_space<vmem>>, vector<1x128x32xf32>
    %111 = vector.shape_cast %110 : vector<1x128x32xf32> to vector<128x32xf32>
    %112 = vector.extract_strided_slice %40 {offsets = [0, 112], sizes = [32, 8], strides = [1, 1]} : vector<32x128xf32> to vector<32x8xf32>
    %cst_52 = arith.constant dense<0.000000e+00> : vector<128x8xf32>
    %113 = tpu.matmul %111, %112, %cst_52 {dimension_numbers = #tpu.dot_dimension_numbers<[1], [0], [0], [1], [0, 0, 1, 1], [], []>} : vector<128x32xf32>, vector<32x8xf32>, vector<128x8xf32> -> vector<128x8xf32>
    %114 = arith.addf %109, %113 : vector<128x8xf32>
    %c15 = arith.constant 15 : index
    %c0_53 = arith.constant 0 : index
    %c0_54 = arith.constant 0 : index
    %115 = vector.load %arg4[%c15, %c0_53, %c0_54] : memref<16x128x32xf32, #tpu.memory_space<vmem>>, vector<1x128x32xf32>
    %116 = vector.shape_cast %115 : vector<1x128x32xf32> to vector<128x32xf32>
    %117 = vector.extract_strided_slice %40 {offsets = [0, 120], sizes = [32, 8], strides = [1, 1]} : vector<32x128xf32> to vector<32x8xf32>
    %cst_55 = arith.constant dense<0.000000e+00> : vector<128x8xf32>
    %118 = tpu.matmul %116, %117, %cst_55 {dimension_numbers = #tpu.dot_dimension_numbers<[1], [0], [0], [1], [0, 0, 1, 1], [], []>} : vector<128x32xf32>, vector<32x8xf32>, vector<128x8xf32> -> vector<128x8xf32>
    %119 = arith.addf %114, %118 : vector<128x8xf32>
    %120 = tpu.iota {dimensions = array<i32: 0>} : vector<8x8xi32>
    %121 = tpu.iota {dimensions = array<i32: 1>} : vector<8x8xi32>
    %122 = arith.cmpi eq, %120, %121 : vector<8x8xi32>
    %123 = arith.extui %122 : vector<8x8xi1> to vector<8x8xi32>
    %124 = arith.sitofp %123 : vector<8x8xi32> to vector<8x8xf32>
    %cst_56 = arith.constant dense<0.000000e+00> : vector<8x128xf32>
    %125 = tpu.matmul %124, %119, %cst_56 {dimension_numbers = #tpu.dot_dimension_numbers<[1], [1], [0], [0], [0, 0, 1, 0], [], []>} : vector<8x8xf32>, vector<128x8xf32>, vector<8x128xf32> -> vector<8x128xf32>
    %c0_57 = arith.constant 0 : index
    %c0_58 = arith.constant 0 : index
    %126 = vector.load %arg5[%c0_57, %c0_58] : memref<1x128xf32, #tpu.memory_space<vmem>>, vector<1x128xf32>
    %127 = vector.broadcast %126 : vector<1x128xf32> to vector<8x128xf32>
    %128 = arith.addf %125, %127 : vector<8x128xf32>
    %c0_59 = arith.constant 0 : index
    %c0_60 = arith.constant 0 : index
    %129 = vector.load %arg6[%c0_59, %c0_60] : memref<8x128xf32, #tpu.memory_space<vmem>>, vector<8x128xf32>
    tpu.vector_store %arg6[%c0_59, %c0_60], %128 {strides = array<i32>} : memref<8x128xf32, #tpu.memory_space<vmem>>, vector<8x128xf32>,
    return
  }
  func.func @transform_0(%arg0: i32) -> (i32, i32) {
    %c0_i32 = arith.constant 0 : i32
    %c0_i32_0 = arith.constant 0 : i32
    return %c0_i32, %arg0 : i32, i32
  }
  func.func @transform_1(%arg0: i32) -> (i32, i32) {
    %c0_i32 = arith.constant 0 : i32
    %c0_i32_0 = arith.constant 0 : i32
    %c0_i32_1 = arith.constant 0 : i32
    return %c0_i32, %c0_i32_0 : i32, i32
  }
  func.func @transform_2(%arg0: i32) -> (i32, i32) {
    %c0_i32 = arith.constant 0 : i32
    %c0_i32_0 = arith.constant 0 : i32
    %c0_i32_1 = arith.constant 0 : i32
    return %c0_i32, %c0_i32_0 : i32, i32
  }
  func.func @transform_3(%arg0: i32) -> (i32, i32, i32) {
    %c0_i32 = arith.constant 0 : i32
    %c0_i32_0 = arith.constant 0 : i32
    %c0_i32_1 = arith.constant 0 : i32
    %c0_i32_2 = arith.constant 0 : i32
    return %c0_i32, %c0_i32_0, %c0_i32_1 : i32, i32, i32
  }
  func.func @transform_4(%arg0: i32) -> (i32, i32) {
    %c0_i32 = arith.constant 0 : i32
    %c0_i32_0 = arith.constant 0 : i32
    %c0_i32_1 = arith.constant 0 : i32
    return %c0_i32, %c0_i32_0 : i32, i32
  }
  func.func @transform_5(%arg0: i32) -> (i32, i32) {
    %c0_i32 = arith.constant 0 : i32
    %c0_i32_0 = arith.constant 0 : i32
    return %arg0, %c0_i32 : i32, i32
  }
}

</mosaic_0001>

<bundles_post_ra>
// kernel: simple_cnn_forward.1
= control target key start
LH: loop header
LB: loop body
LE: loop exit
PB: predicated region body
PF: predicated region fallthrough
CT: control target
= control target key end

     0   :  { %v6740_v3 = vmov 0   ;;  %vm251_vm0 = vcmask 261120   ;;  %s6742_s19 = smov 64   ;;  %s6743_s21 = smov 120   ;;  %vm6757_vm1 = vmmov 0   ;;  %vm4591_vm2 = vcmask 64512   ;;  %s8185_s0 = inlined_call_operand.vmem [shape: bf16[32,2048], index: 0, kind: input, shape index: {}]   ;;  %s8186_s1 = inlined_call_operand.vmem [shape: bf16[32,32], index: 1, kind: input, shape index: {}]   ;;  %s8187_s2 = inlined_call_operand.vmem [shape: f32[32,1], index: 2, kind: input, shape index: {}]   ;;  %s8188_s3 = inlined_call_operand.vmem [shape: f32[16,128,32], index: 3, kind: input, shape index: {}]   ;;  %s8189_s4 = inlined_call_operand.vmem [shape: f32[1,128], index: 4, kind: input, shape index: {}]   ;;  %s8190_s5 = inlined_call_operand.vmem [shape: f32[8,128], index: 5, kind: output, shape index: {}]  }
   0x1   :  { %v25_v0 = vld [vmem:[%s8185_s0] sm:$0xff]  ;;  %v27_v2 = vld [vmem:[%s8185_s0 + $0x10] sm:$0xff]  ;;  %290 = vmatprep.mubr.bf16.mxu1 %v6740_v3  ;;  %396 = vmatprep.mubr.bf16.mxu0 %v6740_v3  ;;  %v26_v15 = vld [vmem:[%s8185_s0 + $0x8] sm:$0xff]  ;;  %s6744_s22 = smov 56   ;;  %s6745_s23 = smov 48  }
   0x2   :  { %v33_v1 = vld [vmem:[%s8185_s0 + $0x40] sm:$0xff]  ;;  %v35_v6 = vld [vmem:[%s8185_s0 + $0x50] sm:$0xff]  ;;  %6586 = vset.pattern.permute.xlu0 %v6740_v3  ;;  %6587 = vset.pattern.permute.xlu1 %v6740_v3  ;;  %v34_v17 = vld [vmem:[%s8185_s0 + $0x48] sm:$0xff]  ;;  %s6747_s24 = smov 40   ;;  %s6748_s25 = smov 104  }
   0x3   :  { %v4721_v4 = vcombine.high %v25_v0, %v33_v1  ;;  %v4720_v5 = vcombine.low %v25_v0, %v33_v1  ;;  %v41_v7 = vld [vmem:[%s8185_s0 + $0x80] sm:$0xff]  ;;  %v4725_v9 = vcombine.high %v27_v2, %v35_v6  ;;  %v4724_v10 = vcombine.low %v27_v2, %v35_v6  ;;  %v43_v12 = vld [vmem:[%s8185_s0 + $0x90] sm:$0xff]  ;;  %v42_v24 = vld [vmem:[%s8185_s0 + $0x88] sm:$0xff]  ;;  %s6749_s26 = smov 32   ;;  %s6750_s27 = smov 96  }
   0x4   :  { %v49_v8 = vld [vmem:[%s8185_s0 + $0xc0] sm:$0xff]  ;;  %v51_v13 = vld [vmem:[%s8185_s0 + $0xd0] sm:$0xff]  ;;  %v4723_v19 = vcombine.high %v26_v15, %v34_v17  ;;  %v50_v25 = vld [vmem:[%s8185_s0 + $0xc8] sm:$0xff]  ;;  %v4722_v26 = vcombine.low %v26_v15, %v34_v17  ;;  %s6751_s28 = smov 24   ;;  %s6752_s29 = smov 88  }
   0x5   :  { %v4737_v11 = vcombine.high %v41_v7, %v49_v8  ;;  %258 = vmatprep.subr.bf16.mxu1 %v4721_v4  ;;  %v4741_v14 = vcombine.high %v43_v12, %v51_v13  ;;  %364 = vmatprep.subr.bf16.mxu0 %v4725_v9  ;;  %v4736_v16 = vcombine.low %v41_v7, %v49_v8  ;;  %v29_v20 = vld [vmem:[%s8185_s0 + $0x20] sm:$0xff]  ;;  %v28_v31 = vld [vmem:[%s8185_s0 + $0x18] sm:$0xff]  ;;  %v31_v35 = vld [vmem:[%s8185_s0 + $0x30] sm:$0xff]  ;;  %s6753_s30 = smov 16   ;;  %s6754_s6 = smov 80  }
   0x6   :  { %259 = vmatpush1.bf16.msra.mxu1 %v4720_v5  ;;  %365 = vmatpush1.bf16.msra.mxu0 %v4724_v10  ;;  %v4740_v18 = vcombine.low %v43_v12, %v51_v13  ;;  %v37_v21 = vld [vmem:[%s8185_s0 + $0x60] sm:$0xff]  ;;  %v4739_v30 = vcombine.high %v42_v24, %v50_v25  ;;  %v36_v32 = vld [vmem:[%s8185_s0 + $0x58] sm:$0xff]  ;;  %v4738_v34 = vcombine.low %v42_v24, %v50_v25  ;;  %v39_v36 = vld [vmem:[%s8185_s0 + $0x70] sm:$0xff]  ;;  %s6755_s7 = smov 8  }
   0x7   :  { %260 = vmatprep.subr.bf16.mxu1 %v4737_v11  ;;  %366 = vmatprep.subr.bf16.mxu0 %v4741_v14  ;;  %v4729_v22 = vcombine.high %v29_v20, %v37_v21  ;;  %v6832_v23 = vld [vmem:[%s8186_s1] sm:$0xff]   ;;  %v4728_v29 = vcombine.low %v29_v20, %v37_v21  ;;  %v4727_v38 = vcombine.high %v28_v31, %v36_v32  ;;  %v59_v39 = vld [vmem:[%s8187_s2 + $0x10] sm:$0xff]  ;;  %v6873_v41 = vld [vmem:[%s8186_s1 + $0x8] sm:$0xff]  }
   0x8   :  { %v45_v27 = vld [vmem:[%s8185_s0 + $0xa0] sm:$0xff]  ;;  %v4733_v42 = vcombine.high %v31_v35, %v39_v36  ;;  %73 = vperm.xlu1 %6587, %v59_v39   ;;  %v58_v43 = vld [vmem:[%s8187_s2 + $0x8] sm:$0xff]  ;;  %v60_v44 = vld [vmem:[%s8187_s2 + $0x18] sm:$0xff]  ;;  %v4726_v47 = vcombine.low %v28_v31, %v36_v32  ;;  %v4732_v50 = vcombine.low %v31_v35, %v39_v36 }
   0x9   :  { %v53_v28 = vld [vmem:[%s8185_s0 + $0xe0] sm:$0xff]  ;;  %v44_v45 = vld [vmem:[%s8185_s0 + $0x98] sm:$0xff]  ;;  %v47_v48 = vld [vmem:[%s8185_s0 + $0xb0] sm:$0xff] }
   0xa   :  { %261 = vmatpush1.bf16.msra.mxu1 %v4736_v16  ;;  %367 = vmatpush1.bf16.msra.mxu0 %v4740_v18  ;;  %v4745_v33 = vcombine.high %v45_v27, %v53_v28  ;;  %v57_v37 = vld [vmem:[%s8187_s2] sm:$0xff]  ;;  %v4744_v40 = vcombine.low %v45_v27, %v53_v28  ;;  %v52_v46 = vld [vmem:[%s8185_s0 + $0xd8] sm:$0xff]  ;;  %v55_v49 = vld [vmem:[%s8185_s0 + $0xf0] sm:$0xff]  ;;  %s6746_s2 = smov 112  }
   0xb   :  { %311 = vmatprep.subr.bf16.mxu1 %v4723_v19  ;;  %470 = vmatprep.subr.bf16.mxu0 %v4729_v22  ;;  %v4743_v51 = vcombine.high %v44_v45, %v52_v46  ;;  %v30_v52 = vld [vmem:[%s8185_s0 + $0x28] sm:$0xff]  ;;  %v4749_v54 = vcombine.high %v47_v48, %v55_v49  ;;  %v4742_v55 = vcombine.low %v44_v45, %v52_v46  ;;  %v32_v62 = vld [vmem:[%s8185_s0 + $0x38] sm:$0xff]  ;;  %vm8150_vm3 = vmpackc.low %vm4591_vm2, %vm4591_vm2 }
   0xc   :  { %63 = vperm.xlu0 %6586, %v57_v37   ;;  %78 = vperm.xlu1 %6587, %v60_v44   ;;  %v38_v53 = vld [vmem:[%s8185_s0 + $0x68] sm:$0xff]  ;;  %v4748_v57 = vcombine.low %v47_v48, %v55_v49  ;;  %v40_v63 = vld [vmem:[%s8185_s0 + $0x78] sm:$0xff] }
   0xd   :  { %4752 = vmatmul.mubr.msk.bf16.vlgmr.msra.gmra.mrb[0].mxu1 %vm251_vm0, %v6832_v23  ;;  %4756 = vmatmul.mubr.msk.bf16.vlgmr.msra.gmra.mrb[0].mxu0 %vm251_vm0, %v6832_v23  ;;  %v4731_v56 = vcombine.high %v30_v52, %v38_v53  ;;  %v46_v58 = vld [vmem:[%s8185_s0 + $0xa8] sm:$0xff]  ;;  %v4730_v60 = vcombine.low %v30_v52, %v38_v53  ;;  %v4735_v1 = vcombine.high %v32_v62, %v40_v63  ;;  %v48_v2 = vld [vmem:[%s8185_s0 + $0xb8] sm:$0xff] }
   0xe   :  { %312 = vmatpush1.bf16.msra.mxu1 %v4722_v26  ;;  %300 = vmatprep.mubr.bf16.mxu1 %v6740_v3  ;;  %v54_v59 = vld [vmem:[%s8185_s0 + $0xe8] sm:$0xff]  ;;  %v56_v4 = vld [vmem:[%s8185_s0 + $0xf8] sm:$0xff]  ;;  %v4734_v5 = vcombine.low %v32_v62, %v40_v63  ;;  %s6741_s0 = smov 72  }
   0xf   :  { %406 = vmatprep.mubr.bf16.mxu0 %v6740_v3  ;;  %471 = vmatpush1.bf16.msra.mxu0 %v4728_v29  ;;  %v4747_v61 = vcombine.high %v46_v58, %v54_v59  ;;  %v4746_v0 = vcombine.low %v46_v58, %v54_v59  ;;  %v4751_v6 = vcombine.high %v48_v2, %v56_v4 }
  0x10   :  { %313 = vmatprep.subr.bf16.mxu1 %v4739_v30  ;;  %472 = vmatprep.subr.bf16.mxu0 %v4745_v33  ;;  %v4750_v7 = vcombine.low %v48_v2, %v56_v4 }
  0x11   :  { %68 = vperm.xlu0 %6586, %v58_v43  }
  0x12   :  { %314 = vmatpush1.bf16.msra.mxu1 %v4738_v34 }
  0x13   :  { %417 = vmatprep.subr.bf16.mxu1 %v4727_v38  ;;  %473 = vmatpush1.bf16.msra.mxu0 %v4744_v40 }
  0x14   :  { %576 = vmatprep.subr.bf16.mxu0 %v4733_v42 }
  0x15   :  { %4753 = vmatmul.mubr.msk.bf16.gmra.mrb[4].mxu1 %vm251_vm0, %v6873_v41  ;;  %4757 = vmatmul.mubr.msk.bf16.gmra.mrb[4].mxu0 %vm251_vm0, %v6873_v41 }
  0x16   :  { %343 = vmatprep.mubr.bf16.mxu1 %v6740_v3  ;;  %502 = vmatprep.mubr.bf16.mxu0 %v6740_v3 }
  0x1d   :  { %4754 = vmatmul.mubr.msk.bf16.vlgmr.msra.gmra.mrb[8].mxu1 %vm251_vm0, %v6832_v23  ;;  %4760 = vmatmul.mubr.msk.bf16.vlgmr.msra.gmra.mrb[8].mxu0 %vm251_vm0, %v6832_v23 }
  0x1e   :  { %418 = vmatpush1.bf16.msra.mxu1 %v4726_v47  ;;  %353 = vmatprep.mubr.bf16.mxu1 %v6740_v3 }
  0x1f   :  { %512 = vmatprep.mubr.bf16.mxu0 %v6740_v3  ;;  %577 = vmatpush1.bf16.msra.mxu0 %v4732_v50 }
  0x20   :  { %419 = vmatprep.subr.bf16.mxu1 %v4743_v51  ;;  %578 = vmatprep.subr.bf16.mxu0 %v4749_v54 }
  0x22   :  { %420 = vmatpush1.bf16.msra.mxu1 %v4742_v55 }
  0x23   :  { %523 = vmatprep.subr.bf16.mxu1 %v4731_v56  ;;  %579 = vmatpush1.bf16.msra.mxu0 %v4748_v57 }
  0x25   :  { %4755 = vmatmul.mubr.msk.bf16.gmra.mrb[12].mxu1 %vm251_vm0, %v6873_v41  ;;  %4761 = vmatmul.mubr.msk.bf16.gmra.mrb[12].mxu0 %vm251_vm0, %v6873_v41 }
  0x26   :  { %449 = vmatprep.mubr.bf16.mxu1 %v6740_v3  ;;  %608 = vmatprep.mubr.bf16.mxu0 %v6740_v3 }
  0x2d   :  { %4758 = vmatmul.mubr.msk.bf16.vlgmr.msra.gmra.mrb[16].mxu1 %vm251_vm0, %v6832_v23  ;;  %4764 = vmatmul.mubr.msk.bf16.vlgmr.msra.gmra.mrb[16].mxu0 %vm251_vm0, %v6832_v23 }
  0x2e   :  { %524 = vmatpush1.bf16.msra.mxu1 %v4730_v60  ;;  %459 = vmatprep.mubr.bf16.mxu1 %v6740_v3 }
  0x2f   :  { %618 = vmatprep.mubr.bf16.mxu0 %v6740_v3  ;;  %525 = vmatprep.subr.bf16.mxu1 %v4747_v61 }
  0x32   :  { %526 = vmatpush1.bf16.msra.mxu1 %v4746_v0 }
  0x33   :  { %629 = vmatprep.subr.bf16.mxu1 %v4735_v1 }
  0x35   :  { %4759 = vmatmul.mubr.msk.bf16.gmra.mrb[20].mxu1 %vm251_vm0, %v6873_v41  ;;  %4765 = vmatmul.mubr.msk.bf16.gmra.mrb[20].mxu0 %vm251_vm0, %v6873_v41 }
  0x36   :  { %555 = vmatprep.mubr.bf16.mxu1 %v6740_v3 }
  0x3d   :  { %4762 = vmatmul.mubr.msk.bf16.vlgmr.msra.gmra.mrb[24].mxu1 %vm251_vm0, %v6832_v23 }
  0x3e   :  { %630 = vmatpush1.bf16.msra.mxu1 %v4734_v5  ;;  %565 = vmatprep.mubr.bf16.mxu1 %v6740_v3 }
  0x3f   :  { %631 = vmatprep.subr.bf16.mxu1 %v4751_v6 }
  0x42   :  { %632 = vmatpush1.bf16.msra.mxu1 %v4750_v7 }
  0x45   :  { %4763 = vmatmul.mubr.msk.bf16.gmra.mrb[28].mxu1 %vm251_vm0, %v6873_v41 }
  0x46   :  { %661 = vmatprep.mubr.bf16.mxu1 %v6740_v3 }
  0x4d   :  { %4766 = vmatmul.mubr.msk.bf16.vlgmr.msra.gmra.mrb[32].mxu1 %vm251_vm0, %v6832_v23 }
  0x4e   :  { %671 = vmatprep.mubr.bf16.mxu1 %v6740_v3 }
  0x55   :  { %4767 = vmatmul.mubr.msk.bf16.gmra.mrb[36].mxu1 %vm251_vm0, %v6873_v41 }
  0x87   :  { %v6959_v9 = vpop.permute.xlu1 %73 }
  0x8b   :  { %v6957_v8 = vpop.permute.xlu0 %63  ;;  %v6967_v29 = vpop.permute.xlu1 %78 }
  0x90   :  { %v6961_v11 = vpop.permute.xlu0 %68 }
  0xe0   :  { %v292_v10 = vpop.f32.mrb[0].mxu1  ;;  %v398_v14 = vpop.f32.mrb[0].mxu0 }
  0xe1   :  { %v293_v12 = vadd.f32 %v292_v10, %v6957_v8  ;;  %v294_v13 = vpop.f32.mrb[1].mxu1  ;;  %v400_v17 = vpop.f32.mrb[1].mxu0  ;;  %v399_v50 = vadd.f32 %v398_v14, %v6957_v8 }
  0xe2   :  { %v295_v15 = vadd.f32 %v294_v13, %v6957_v8  ;;  %v296_v16 = vpop.f32.mrb[2].mxu1  ;;  %v402_v20 = vpop.f32.mrb[2].mxu0  ;;  %v401_v57 = vadd.f32 %v400_v17, %v6957_v8 }
  0xe3   :  { %v682_v18 = vmax.f32 %v293_v12, 0.0  ;;  %v297_v3 = vadd.f32 %v296_v16, %v6961_v11  ;;  %v298_v19 = vpop.f32.mrb[3].mxu1  ;;  %v404_v23 = vpop.f32.mrb[3].mxu0  ;;  %v403_v59 = vadd.f32 %v402_v20, %v6961_v11  ;;  %v686_v2 = vmax.f32 %v399_v50, 0.0 }
  0xe4   :  { %v683_v21 = vmax.f32 %v295_v15, 0.0  ;;  %v299_v22 = vadd.f32 %v298_v19, %v6961_v11  ;;  %v405_v63 = vadd.f32 %v404_v23, %v6961_v11  ;;  %v687_v10 = vmax.f32 %v401_v57, 0.0 }
  0xe5   :  { %v698_v24 = vmax.f32 %v297_v3, 0.0  ;;  %v702_v12 = vmax.f32 %v403_v59, 0.0 }
  0xe6   :  { %v746_v25 = vadd.f32 %v683_v21, %v682_v18  ;;  %v699_v26 = vmax.f32 %v299_v22, 0.0  ;;  %v703_v13 = vmax.f32 %v405_v63, 0.0 }
  0xe8   :  { %v747_v27 = vadd.f32 %v699_v26, %v698_v24  ;;  %v302_v28 = vpop.f32.mrb[4].mxu1  ;;  %v408_v32 = vpop.f32.mrb[4].mxu0 }
  0xe9   :  { %v303_v30 = vadd.f32 %v302_v28, %v6959_v9  ;;  %v304_v31 = vpop.f32.mrb[5].mxu1  ;;  %v6971_v35 = vpop.f32.mrb[5].mxu0  ;;  %v409_v17 = vadd.f32 %v408_v32, %v6959_v9 }
  0xea   :  { %v305_v33 = vadd.f32 %v304_v31, %v6959_v9  ;;  %v306_v34 = vpop.f32.mrb[6].mxu1  ;;  %v412_v39 = vpop.f32.mrb[6].mxu0 }
  0xeb   :  { %v714_v36 = vmax.f32 %v303_v30, 0.0  ;;  %v307_v37 = vadd.f32 %v306_v34, %v6967_v29  ;;  %v308_v38 = vpop.f32.mrb[7].mxu1  ;;  %v414_v42 = vpop.f32.mrb[7].mxu0  ;;  %v413_v20 = vadd.f32 %v412_v39, %v6967_v29  ;;  %v411_v39 = vadd.f32 %v6971_v35, %v6959_v9 }
  0xec   :  { %v715_v40 = vmax.f32 %v305_v33, 0.0  ;;  %v309_v41 = vadd.f32 %v308_v38, %v6967_v29 }
  0xed   :  { %v730_v43 = vmax.f32 %v307_v37, 0.0 }
  0xee   :  { %v748_v44 = vadd.f32 %v715_v40, %v714_v36  ;;  %v731_v45 = vmax.f32 %v309_v41, 0.0  ;;  %v718_v36 = vmax.f32 %v409_v17, 0.0  ;;  %v415_v40 = vadd.f32 %v414_v42, %v6967_v29 }
  0xf0   :  { %v749_v46 = vadd.f32 %v731_v45, %v730_v43  ;;  %v345_v47 = vpop.f32.mrb[8].mxu1  ;;  %v504_v51 = vpop.f32.mrb[8].mxu0  ;;  %v734_v43 = vmax.f32 %v413_v20, 0.0  ;;  %v735_v57 = vmax.f32 %v415_v40, 0.0 }
  0xf1   :  { %v346_v48 = vadd.f32 %v345_v47, %v6957_v8  ;;  %v347_v49 = vpop.f32.mrb[9].mxu1  ;;  %v6978_v54 = vpop.f32.mrb[9].mxu0  ;;  %v505_v50 = vadd.f32 %v504_v51, %v6957_v8 }
  0xf2   :  { %v348_v52 = vadd.f32 %v347_v49, %v6957_v8  ;;  %v349_v53 = vpop.f32.mrb[10].mxu1  ;;  %v508_v60 = vpop.f32.mrb[10].mxu0 }
  0xf3   :  { %v684_v55 = vmax.f32 %v346_v48, 0.0  ;;  %v350_v56 = vadd.f32 %v349_v53, %v6961_v11  ;;  %v351_v58 = vpop.f32.mrb[11].mxu1  ;;  %v6985_v0 = vpop.f32.mrb[11].mxu0 }
  0xf4   :  { %v685_v61 = vmax.f32 %v348_v52, 0.0  ;;  %v352_v62 = vadd.f32 %v351_v58, %v6961_v11 }
  0xf5   :  { %v750_v1 = vadd.f32 %v746_v25, %v684_v55  ;;  %v700_v4 = vmax.f32 %v350_v56, 0.0 }
  0xf6   :  { %v701_v5 = vmax.f32 %v352_v62, 0.0 }
  0xf7   :  { %v754_v6 = vadd.f32 %v750_v1, %v685_v61  ;;  %v751_v7 = vadd.f32 %v747_v27, %v700_v4 }
  0xf8   :  { %v355_v14 = vpop.f32.mrb[12].mxu1  ;;  %v514_v19 = vpop.f32.mrb[12].mxu0 }
  0xf9   :  { %v758_v15 = vadd.f32 %v754_v6, %v686_v2  ;;  %v755_v16 = vadd.f32 %v751_v7, %v701_v5  ;;  %v356_v18 = vadd.f32 %v355_v14, %v6959_v9  ;;  %v357_v3 = vpop.f32.mrb[13].mxu1  ;;  %v6991_v23 = vpop.f32.mrb[13].mxu0  ;;  %v690_v5 = vmax.f32 %v505_v50, 0.0 }
  0xfa   :  { %v358_v21 = vadd.f32 %v357_v3, %v6959_v9  ;;  %v359_v22 = vpop.f32.mrb[14].mxu1  ;;  %v6994_v30 = vpop.f32.mrb[14].mxu0  ;;  %v507_v6 = vadd.f32 %v6978_v54, %v6957_v8  ;;  %v515_v3 = vadd.f32 %v514_v19, %v6959_v9  ;;  %v517_v19 = vadd.f32 %v6991_v23, %v6959_v9 }
  0xfb   :  { %v762_v24 = vadd.f32 %v758_v15, %v687_v10  ;;  %v759_v25 = vadd.f32 %v755_v16, %v702_v12  ;;  %v716_v26 = vmax.f32 %v356_v18, 0.0  ;;  %v360_v27 = vadd.f32 %v359_v22, %v6967_v29  ;;  %v361_v28 = vpop.f32.mrb[15].mxu1  ;;  %v6997_v33 = vpop.f32.mrb[15].mxu0 }
  0xfc   :  { %v717_v31 = vmax.f32 %v358_v21, 0.0  ;;  %v362_v32 = vadd.f32 %v361_v28, %v6967_v29 }
  0xfd   :  { %v763_v34 = vadd.f32 %v759_v25, %v703_v13  ;;  %v752_v37 = vadd.f32 %v748_v44, %v716_v26  ;;  %v732_v38 = vmax.f32 %v360_v27, 0.0  ;;  %v719_v44 = vmax.f32 %v411_v39, 0.0 }
  0xfe   :  { %v733_v41 = vmax.f32 %v362_v32, 0.0 }
  0xff   :  { %v756_v45 = vadd.f32 %v752_v37, %v717_v31  ;;  %v753_v47 = vadd.f32 %v749_v46, %v732_v38  ;;  %v509_v46 = vadd.f32 %v508_v60, %v6961_v11  ;;  %v511_v60 = vadd.f32 %v6985_v0, %v6961_v11 }
 0x100   :  { %v451_v48 = vpop.f32.mrb[16].mxu1  ;;  %v7004_v56 = vpop.f32.mrb[16].mxu0 }
 0x101   :  { %v760_v49 = vadd.f32 %v756_v45, %v718_v36  ;;  %v757_v52 = vadd.f32 %v753_v47, %v733_v41  ;;  %v452_v53 = vadd.f32 %v451_v48, %v6957_v8  ;;  %v453_v55 = vpop.f32.mrb[17].mxu1  ;;  %v7007_v42 = vpop.f32.mrb[17].mxu0  ;;  %v706_v15 = vmax.f32 %v509_v46, 0.0 }
 0x102   :  { %v454_v35 = vadd.f32 %v453_v55, %v6957_v8  ;;  %v455_v58 = vpop.f32.mrb[18].mxu1  ;;  %v7011_v63 = vpop.f32.mrb[18].mxu0  ;;  %v707_v26 = vmax.f32 %v511_v60, 0.0  ;;  %v722_v41 = vmax.f32 %v515_v3, 0.0  ;;  %v521_v48 = vadd.f32 %v6997_v33, %v6967_v29 }
 0x103   :  { %v761_v59 = vadd.f32 %v757_v52, %v734_v43  ;;  %v688_v61 = vmax.f32 %v452_v53, 0.0  ;;  %v456_v62 = vadd.f32 %v455_v58, %v6961_v11  ;;  %v457_v51 = vpop.f32.mrb[19].mxu1  ;;  %v7014_v4 = vpop.f32.mrb[19].mxu0  ;;  %v764_v13 = vadd.f32 %v760_v49, %v719_v44 }
 0x104   :  { %v689_v1 = vmax.f32 %v454_v35, 0.0  ;;  %v458_v2 = vadd.f32 %v457_v51, %v6961_v11  ;;  %v519_v43 = vadd.f32 %v6994_v30, %v6967_v29  ;;  %v723_v44 = vmax.f32 %v517_v19, 0.0 }
 0x105   :  { %v766_v7 = vadd.f32 %v762_v24, %v688_v61  ;;  %v704_v10 = vmax.f32 %v456_v62, 0.0  ;;  %v765_v14 = vadd.f32 %v761_v59, %v735_v57  ;;  %v691_v24 = vmax.f32 %v507_v6, 0.0 }
 0x106   :  { %v705_v12 = vmax.f32 %v458_v2, 0.0  ;;  %v738_v57 = vmax.f32 %v519_v43, 0.0  ;;  %v739_v61 = vmax.f32 %v521_v48, 0.0  ;;  %v611_v30 = vadd.f32 %v7004_v56, %v6957_v8 }
 0x107   :  { %v770_v16 = vadd.f32 %v766_v7, %v689_v1  ;;  %v767_v17 = vadd.f32 %v763_v34, %v704_v10  ;;  %v613_v7 = vadd.f32 %v7007_v42, %v6957_v8 }
 0x108   :  { %v461_v18 = vpop.f32.mrb[20].mxu1  ;;  %v620_v54 = vpop.f32.mrb[20].mxu0 }
 0x109   :  { %v774_v20 = vadd.f32 %v770_v16, %v690_v5  ;;  %v771_v21 = vadd.f32 %v767_v17, %v705_v12  ;;  %v462_v22 = vadd.f32 %v461_v18, %v6959_v9  ;;  %v463_v25 = vpop.f32.mrb[21].mxu1  ;;  %v7023_v28 = vpop.f32.mrb[21].mxu0  ;;  %v615_v12 = vadd.f32 %v7011_v63, %v6961_v11 }
 0x10a   :  { %v464_v27 = vadd.f32 %v463_v25, %v6959_v9  ;;  %v465_v0 = vpop.f32.mrb[22].mxu1  ;;  %v624_v37 = vpop.f32.mrb[22].mxu0  ;;  %v694_v17 = vmax.f32 %v611_v30, 0.0  ;;  %v621_v63 = vadd.f32 %v620_v54, %v6959_v9 }
 0x10b   :  { %v775_v31 = vadd.f32 %v771_v21, %v706_v15  ;;  %v720_v32 = vmax.f32 %v462_v22, 0.0  ;;  %v466_v34 = vadd.f32 %v465_v0, %v6967_v29  ;;  %v467_v36 = vpop.f32.mrb[23].mxu1  ;;  %v626_v40 = vpop.f32.mrb[23].mxu0  ;;  %v778_v50 = vadd.f32 %v774_v20, %v691_v24 }
 0x10c   :  { %v721_v38 = vmax.f32 %v464_v27, 0.0  ;;  %v468_v39 = vadd.f32 %v467_v36, %v6967_v29  ;;  %v617_v15 = vadd.f32 %v7014_v4, %v6961_v11  ;;  %v695_v20 = vmax.f32 %v613_v7, 0.0 }
 0x10d   :  { %v768_v45 = vadd.f32 %v764_v13, %v720_v32  ;;  %v736_v47 = vmax.f32 %v466_v34, 0.0  ;;  %v779_v52 = vadd.f32 %v775_v31, %v707_v26  ;;  %v710_v22 = vmax.f32 %v615_v12, 0.0 }
 0x10e   :  { %v737_v49 = vmax.f32 %v468_v39, 0.0  ;;  %v711_v27 = vmax.f32 %v617_v15, 0.0  ;;  %v625_v43 = vadd.f32 %v624_v37, %v6967_v29  ;;  %v627_v48 = vadd.f32 %v626_v40, %v6967_v29 }
 0x10f   :  { %v772_v53 = vadd.f32 %v768_v45, %v721_v38  ;;  %v769_v55 = vadd.f32 %v765_v14, %v736_v47  ;;  %v623_v38 = vadd.f32 %v7023_v28, %v6959_v9 }
 0x110   :  { %v557_v23 = vpop.f32.mrb[24].mxu1 }
 0x111   :  { %v776_v35 = vadd.f32 %v772_v53, %v722_v41  ;;  %v773_v58 = vadd.f32 %v769_v55, %v737_v49  ;;  %v558_v59 = vadd.f32 %v557_v23, %v6957_v8  ;;  %v559_v46 = vpop.f32.mrb[25].mxu1  ;;  %v727_v55 = vmax.f32 %v623_v38, 0.0 }
 0x112   :  { %v560_v62 = vadd.f32 %v559_v46, %v6957_v8  ;;  %v561_v33 = vpop.f32.mrb[26].mxu1  ;;  %v742_v23 = vmax.f32 %v625_v43, 0.0 }
 0x113   :  { %v777_v51 = vadd.f32 %v773_v58, %v738_v57  ;;  %v692_v1 = vmax.f32 %v558_v59, 0.0  ;;  %v562_v2 = vadd.f32 %v561_v33, %v6961_v11  ;;  %v563_v5 = vpop.f32.mrb[27].mxu1  ;;  %v780_v6 = vadd.f32 %v776_v35, %v723_v44 }
 0x114   :  { %v693_v10 = vmax.f32 %v560_v62, 0.0  ;;  %v564_v60 = vadd.f32 %v563_v5, %v6961_v11  ;;  %v743_v59 = vmax.f32 %v627_v48, 0.0 }
 0x115   :  { %v782_v13 = vadd.f32 %v778_v50, %v692_v1  ;;  %v708_v56 = vmax.f32 %v562_v2, 0.0  ;;  %v781_v14 = vadd.f32 %v777_v51, %v739_v61  ;;  %v726_v50 = vmax.f32 %v621_v63, 0.0 }
 0x116   :  { %v709_v16 = vmax.f32 %v564_v60, 0.0 }
 0x117   :  { %v786_v18 = vadd.f32 %v782_v13, %v693_v10  ;;  %v783_v3 = vadd.f32 %v779_v52, %v708_v56 }
 0x118   :  { %v567_v21 = vpop.f32.mrb[28].mxu1 }
 0x119   :  { %v790_v42 = vadd.f32 %v786_v18, %v694_v17  ;;  %v787_v25 = vadd.f32 %v783_v3, %v709_v16  ;;  %v568_v24 = vadd.f32 %v567_v21, %v6959_v9  ;;  %v569_v26 = vpop.f32.mrb[29].mxu1 }
 0x11a   :  { %v570_v0 = vadd.f32 %v569_v26, %v6959_v9  ;;  %v571_v31 = vpop.f32.mrb[30].mxu1 }
 0x11b   :  { %v791_v32 = vadd.f32 %v787_v25, %v710_v22  ;;  %v724_v4 = vmax.f32 %v568_v24, 0.0  ;;  %v572_v34 = vadd.f32 %v571_v31, %v6967_v29  ;;  %v573_v36 = vpop.f32.mrb[31].mxu1  ;;  %v794_v19 = vadd.f32 %v790_v42, %v695_v20 }
 0x11c   :  { %v725_v39 = vmax.f32 %v570_v0, 0.0  ;;  %v574_v41 = vadd.f32 %v573_v36, %v6967_v29 }
 0x11d   :  { %v784_v45 = vadd.f32 %v780_v6, %v724_v4  ;;  %v740_v47 = vmax.f32 %v572_v34, 0.0  ;;  %v795_v54 = vadd.f32 %v791_v32, %v711_v27 }
 0x11e   :  { %v741_v49 = vmax.f32 %v574_v41, 0.0 }
 0x11f   :  { %v788_v52 = vadd.f32 %v784_v45, %v725_v39  ;;  %v785_v53 = vadd.f32 %v781_v14, %v740_v47 }
 0x120   :  { %v663_v44 = vpop.f32.mrb[32].mxu1 }
 0x121   :  { %v792_v57 = vadd.f32 %v788_v52, %v726_v50  ;;  %v789_v35 = vadd.f32 %v785_v53, %v741_v49  ;;  %v664_v28 = vadd.f32 %v663_v44, %v6957_v8  ;;  %v665_v58 = vpop.f32.mrb[33].mxu1 }
 0x122   :  { %v666_v37 = vadd.f32 %v665_v58, %v6957_v8  ;;  %v667_v46 = vpop.f32.mrb[34].mxu1 }
 0x123   :  { %v793_v61 = vadd.f32 %v789_v35, %v742_v23  ;;  %v696_v30 = vmax.f32 %v664_v28, 0.0  ;;  %v668_v40 = vadd.f32 %v667_v46, %v6961_v11  ;;  %v669_v62 = vpop.f32.mrb[35].mxu1  ;;  %v796_v33 = vadd.f32 %v792_v57, %v727_v55 }
 0x124   :  { %v697_v51 = vmax.f32 %v666_v37, 0.0  ;;  %v670_v1 = vadd.f32 %v669_v62, %v6961_v11  ;;  %v4977_v37 = vld [vmem:[%s8188_s3 + $0x388] sm:$0xff] }
 0x125   :  { %v798_v2 = vadd.f32 %v794_v19, %v696_v30  ;;  %v712_v5 = vmax.f32 %v668_v40, 0.0  ;;  %v797_v6 = vadd.f32 %v793_v61, %v743_v59 }
 0x126   :  { %v713_v7 = vmax.f32 %v670_v1, 0.0  ;;  %v4769_v1 = vld [vmem:[%s8188_s3 + $0x88] sm:$0xff] }
 0x127   :  { %v802_v10 = vadd.f32 %v798_v2, %v697_v51  ;;  %v799_v60 = vadd.f32 %v795_v54, %v712_v5  ;;  %v4978_v51 = vld [vmem:[%s8188_s3 + $0x390] sm:$0xff]  ;;  %v4979_v2 = vld [vmem:[%s8188_s3 + $0x398] sm:$0xff] }
 0x128   :  { %v673_v12 = vpop.f32.mrb[36].mxu1 }
 0x129   :  { %v803_v13 = vadd.f32 %v799_v60, %v713_v7  ;;  %v674_v8 = vadd.f32 %v673_v12, %v6959_v9  ;;  %v675_v56 = vpop.f32.mrb[37].mxu1  ;;  %v806_v16 = vmul.f32 0.0625, %v802_v10  ;;  %v4770_v60 = vld [vmem:[%s8188_s3 + $0x90] sm:$0xff]  ;;  %v4980_v12 = vld [vmem:[%s8188_s3 + $0x3a0] sm:$0xff] }
 0x12a   :  { %v676_v14 = vadd.f32 %v675_v56, %v6959_v9  ;;  %v677_v15 = vpop.f32.mrb[38].mxu1  ;;  %v4976_v9 = vld [vmem:[%s8188_s3 + $0x380] sm:$0xff] }
 0x12b   :  { %v807_v17 = vmul.f32 0.0625, %v803_v13  ;;  %v728_v18 = vmax.f32 %v674_v8, 0.0  ;;  %v678_v3 = vadd.f32 %v677_v15, %v6967_v29  ;;  %v679_v11 = vpop.f32.mrb[39].mxu1  ;;  %5852 = vmatprep.mubr.msk.f32.mxu0 %vm251_vm0, %v4976_v9  ;;  %v4771_v13 = vld [vmem:[%s8188_s3 + $0x98] sm:$0xff]  ;;  %v4981_v8 = vld [vmem:[%s8188_s3 + $0x3a8] sm:$0xff]  ;;  %v4772_v56 = vld [vmem:[%s8188_s3 + $0xa0] sm:$0xff] }
 0x12c   :  { %v729_v20 = vmax.f32 %v676_v14, 0.0  ;;  %v680_v21 = vadd.f32 %v679_v11, %v6967_v29  ;;  %v4768_v29 = vld [vmem:[%s8188_s3 + $0x80] sm:$0xff]  ;;  %v4982_v14 = vld [vmem:[%s8188_s3 + $0x3b0] sm:$0xff]  ;;  %v4775_v11 = vld [vmem:[%s8188_s3 + $0xb8] sm:$0xff] }
 0x12d   :  { %v800_v22 = vadd.f32 %v796_v33, %v728_v18  ;;  %v744_v42 = vmax.f32 %v678_v3, 0.0  ;;  %v6588_v25 = vpack.i.bf16 %v807_v17, %v806_v16  ;;  %v7066_v0 = vpack.c.bf16 %v807_v17, %v806_v16  ;;  %5628 = vmatprep.mubr.msk.f32.mxu1 %vm251_vm0, %v4768_v29  ;;  %v4773_v16 = vld [vmem:[%s8188_s3 + $0xa8] sm:$0xff]  ;;  %v4983_v17 = vld [vmem:[%s8188_s3 + $0x3b8] sm:$0xff]  ;;  %v4774_v18 = vld [vmem:[%s8188_s3 + $0xb0] sm:$0xff] }
 0x12e   :  { %v745_v24 = vmax.f32 %v680_v21, 0.0  ;;  %v4984_v3 = vld [vmem:[%s8188_s3 + $0x3c0] sm:$0xff]  ;;  %v4991_v29 = vld [vmem:[%s8188_s3 + $0x3f8] sm:$0xff] }
 0x12f   :  { %v804_v26 = vadd.f32 %v800_v22, %v729_v20  ;;  %v801_v27 = vadd.f32 %v797_v6, %v744_v42  ;;  %6589 = vrot.lane.b32.xlu0 %v6588_v25, %s6741_s0  ;;  %v4985_v20 = vld [vmem:[%s8188_s3 + $0x3c8] sm:$0xff]  ;;  %v4776_v21 = vld [vmem:[%s8188_s3 + $0xc0] sm:$0xff]  ;;  %v4986_v22 = vld [vmem:[%s8188_s3 + $0x3d0] sm:$0xff] }
 0x130   :  { %v4777_v42 = vld [vmem:[%s8188_s3 + $0xc8] sm:$0xff]  ;;  %v4780_v9 = vld [vmem:[%s8188_s3 + $0xe0] sm:$0xff] }
 0x131   :  { %v805_v63 = vadd.f32 %v801_v27, %v745_v24  ;;  %v808_v31 = vmul.f32 0.0625, %v804_v26  ;;  %v4778_v24 = vld [vmem:[%s8188_s3 + $0xd0] sm:$0xff]  ;;  %v4988_v26 = vld [vmem:[%s8188_s3 + $0x3e0] sm:$0xff]  ;;  %v4779_v27 = vld [vmem:[%s8188_s3 + $0xd8] sm:$0xff] }
 0x133   :  { %v809_v32 = vmul.f32 0.0625, %v805_v63  ;;  %6599 = vrot.lane.b32.xlu0 %v6588_v25, %s6742_s19  ;;  %v4989_v63 = vld [vmem:[%s8188_s3 + $0x3e8] sm:$0xff] }
 0x135   :  { %v6593_v4 = vpack.i.bf16 %v809_v32, %v808_v31  ;;  %v7072_v34 = vpack.c.bf16 %v809_v32, %v808_v31  ;;  %v4781_v32 = vld [vmem:[%s8188_s3 + $0xe8] sm:$0xff] }
 0x137   :  { %6594 = vrot.lane.b32.xlu1 %v6593_v4, %s6741_s0  ;;  %6609 = vrot.lane.b32.xlu0 %v6588_v25, %s6743_s21 }
 0x13b   :  { %6604 = vrot.lane.b32.xlu1 %v6593_v4, %s6742_s19  ;;  %6619 = vrot.lane.b32.xlu0 %v6593_v4, %s6743_s21 }
 0x13f   :  { %6614 = vrot.lane.b32.xlu1 %v6588_v25, %s6744_s22  ;;  %6629 = vrot.lane.b32.xlu0 %v6588_v25, %s6745_s23 }
 0x143   :  { %6624 = vrot.lane.b32.xlu1 %v6593_v4, %s6744_s22  ;;  %6639 = vrot.lane.b32.xlu0 %v6588_v25, %s6746_s2 }
 0x147   :  { %6634 = vrot.lane.b32.xlu1 %v6593_v4, %s6745_s23  ;;  %6649 = vrot.lane.b32.xlu0 %v6593_v4, %s6746_s2 }
 0x14b   :  { %6644 = vrot.lane.b32.xlu1 %v6588_v25, %s6747_s24  ;;  %6659 = vrot.lane.b32.xlu0 %v6588_v25, %s6748_s25 }
 0x14f   :  { %6654 = vrot.lane.b32.xlu1 %v6593_v4, %s6747_s24  ;;  %6669 = vrot.lane.b32.xlu0 %v6593_v4, %s6748_s25 }
 0x153   :  { %6664 = vrot.lane.b32.xlu1 %v6588_v25, %s6749_s26  ;;  %6679 = vrot.lane.b32.xlu0 %v6588_v25, %s6750_s27 }
 0x157   :  { %6674 = vrot.lane.b32.xlu1 %v6593_v4, %s6749_s26  ;;  %6689 = vrot.lane.b32.xlu0 %v6593_v4, %s6750_s27 }
 0x15b   :  { %6684 = vrot.lane.b32.xlu1 %v6588_v25, %s6751_s28  ;;  %6699 = vrot.lane.b32.xlu0 %v6588_v25, %s6752_s29 }
 0x15f   :  { %6694 = vrot.lane.b32.xlu1 %v6593_v4, %s6751_s28  ;;  %6709 = vrot.lane.b32.xlu0 %v6593_v4, %s6752_s29 }
 0x163   :  { %6704 = vrot.lane.b32.xlu1 %v6588_v25, %s6753_s30  ;;  %6719 = vrot.lane.b32.xlu0 %v6588_v25, %s6754_s6 }
 0x167   :  { %6714 = vrot.lane.b32.xlu1 %v6593_v4, %s6753_s30  ;;  %6729 = vrot.lane.b32.xlu0 %v6593_v4, %s6754_s6 }
 0x16b   :  { %6724 = vrot.lane.b32.xlu1 %v6588_v25, %s6755_s7  ;;  %v4987_v25 = vld [vmem:[%s8188_s3 + $0x3d8] sm:$0xff] }
 0x16f   :  { %6734 = vrot.lane.b32.xlu1 %v6593_v4, %s6755_s7  ;;  %v4782_v4 = vld [vmem:[%s8188_s3 + $0xf0] sm:$0xff] }
 0x1a1   :  { %v6590_v36 = vpop.permute.xlu0 %6589 }
 0x1a2   :  { %v6592_v19 = vunpack.i.h.bf16 %v6590_v36  ;;  %v6591_v38 = vunpack.i.l.bf16 %v6590_v36 }
 0x1a4   :  { %v6223_v39 = vpack.c.bf16 %v6592_v19, %v6591_v38 }
 0x1a5   :  { %v6600_v41 = vpop.permute.xlu0 %6599 }
 0x1a6   :  { %6224 = vmatprep.subr.bf16.mxu0 %v6223_v39  ;;  %v6602_v43 = vunpack.i.h.bf16 %v6600_v41  ;;  %v6601_v45 = vunpack.i.l.bf16 %v6600_v41  ;;  %v5009_v41 = vld [vmem:[%s8188_s3 + $0x408] sm:$0xff] }
 0x1a7   :  { %6226 = vmatpush3.bf16.msra.mxu0 %v6223_v39  ;;  %v4783_v39 = vld [vmem:[%s8188_s3 + $0xf8] sm:$0xff] }
 0x1a8   :  { %v6231_v44 = vpack.c.bf16 %v6602_v43, %v6601_v45  ;;  %v810_v43 = vld [vmem:[%s8188_s3] sm:$0xff] }
 0x1a9   :  { %v6595_v47 = vpop.permute.xlu1 %6594  ;;  %v6610_v54 = vpop.permute.xlu0 %6609 }
 0x1aa   :  { %v6597_v48 = vunpack.i.h.bf16 %v6595_v47  ;;  %v6596_v49 = vunpack.i.l.bf16 %v6595_v47  ;;  %v6612_v50 = vunpack.i.h.bf16 %v6610_v54  ;;  %v6611_v52 = vunpack.i.l.bf16 %v6610_v54  ;;  %v5010_v47 = vld [vmem:[%s8188_s3 + $0x410] sm:$0xff] }
 0x1ac   :  { %v6227_v53 = vpack.c.bf16 %v6597_v48, %v6596_v49  ;;  %v6167_v55 = vpack.c.bf16 %v6612_v50, %v6611_v52 }
 0x1ad   :  { %v6605_v23 = vpop.permute.xlu1 %6604  ;;  %v6620_v57 = vpop.permute.xlu0 %6619 }
 0x1ae   :  { %v6607_v35 = vunpack.i.h.bf16 %v6605_v23  ;;  %v6606_v28 = vunpack.i.l.bf16 %v6605_v23  ;;  %v6622_v58 = vunpack.i.h.bf16 %v6620_v57  ;;  %v6621_v59 = vunpack.i.l.bf16 %v6620_v57  ;;  %6168 = vmatprep.subr.bf16.mxu1 %v6167_v55  ;;  %6228 = vmatprep.subr.bf16.mxu0 %v6227_v53 }
 0x1af   :  { %6170 = vmatpush3.bf16.msra.mxu1 %v6167_v55  ;;  %6230 = vmatpush3.bf16.msra.mxu0 %v6227_v53  ;;  %v811_v53 = vld [vmem:[%s8188_s3 + $0x8] sm:$0xff]  ;;  %v5011_v55 = vld [vmem:[%s8188_s3 + $0x418] sm:$0xff] }
 0x1b0   :  { %v6171_v46 = vpack.c.bf16 %v6622_v58, %v6621_v59  ;;  %6232 = vmatprep.subr.bf16.mxu0 %v6231_v44  ;;  %v6235_v40 = vpack.c.bf16 %v6607_v35, %v6606_v28  ;;  %v812_v28 = vld [vmem:[%s8188_s3 + $0x10] sm:$0xff]  ;;  %v5012_v58 = vld [vmem:[%s8188_s3 + $0x420] sm:$0xff]  ;;  %v813_v59 = vld [vmem:[%s8188_s3 + $0x18] sm:$0xff] }
 0x1b1   :  { %v6615_v61 = vpop.permute.xlu1 %6614  ;;  %v7077_v30 = vpop.permute.xlu0 %6629 }
 0x1b2   :  { %v6617_v62 = vunpack.i.h.bf16 %v6615_v61  ;;  %v6616_v33 = vunpack.i.l.bf16 %v6615_v61  ;;  %6172 = vmatprep.subr.bf16.mxu1 %v6171_v46  ;;  %5853 = vmatmul.mubr.msk.f32.vlgmr.msra.gmra.mrb[24].mxu0 %vm251_vm0, %v4977_v37  ;;  %v6632_v45 = vunpack.i.h.bf16 %v7077_v30  ;;  %v6631_v54 = vunpack.i.l.bf16 %v7077_v30  ;;  %v5013_v37 = vld [vmem:[%s8188_s3 + $0x428] sm:$0xff]  ;;  %v5014_v61 = vld [vmem:[%s8188_s3 + $0x430] sm:$0xff] }
 0x1b3   :  { %6174 = vmatpush3.bf16.msra.mxu1 %v6171_v46  ;;  %6234 = vmatpush3.bf16.msra.mxu0 %v6231_v44  ;;  %v814_v46 = vld [vmem:[%s8188_s3 + $0x20] sm:$0xff] }
 0x1b4   :  { %6176 = vmatprep.subr.bf16.mxu1 %v7066_v0  ;;  %6236 = vmatprep.subr.bf16.mxu0 %v6235_v40  ;;  %v7091_v6 = vpack.c.bf16 %v6617_v62, %v6616_v33  ;;  %v7231_v44 = vpack.c.bf16 %v6632_v45, %v6631_v54  ;;  %v5015_v62 = vld [vmem:[%s8188_s3 + $0x438] sm:$0xff]  ;;  %v816_v33 = vld [vmem:[%s8188_s3 + $0x30] sm:$0xff]  ;;  %v5045_v45 = vld [vmem:[%s8188_s3 + $0x4a8] sm:$0xff] }
 0x1b5   :  { %v6640_v5 = vpop.permute.xlu0 %6639  ;;  %5855 = vmatprep.mubr.msk.f32.mxu0 %vm251_vm0, %v4978_v51  ;;  %v6625_v31 = vpop.permute.xlu1 %6624  ;;  %v5016_v51 = vld [vmem:[%s8188_s3 + $0x440] sm:$0xff]  ;;  %v5046_v54 = vld [vmem:[%s8188_s3 + $0x4b0] sm:$0xff] }
 0x1b6   :  { %v6642_v7 = vunpack.i.h.bf16 %v6640_v5  ;;  %v6641_v10 = vunpack.i.l.bf16 %v6640_v5  ;;  %5629 = vmatmul.mubr.msk.f32.vlgmr.msra.gmra.mrb[40].mxu1 %vm251_vm0, %v4769_v1  ;;  %5856 = vmatmul.mubr.msk.f32.gmra.mrb[26].mxu0 %vm251_vm0, %v4979_v2  ;;  %v6627_v19 = vunpack.i.h.bf16 %v6625_v31  ;;  %v6626_v38 = vunpack.i.l.bf16 %v6625_v31  ;;  %v817_v1 = vld [vmem:[%s8188_s3 + $0x38] sm:$0xff]  ;;  %v5017_v2 = vld [vmem:[%s8188_s3 + $0x448] sm:$0xff]  ;;  %v818_v5 = vld [vmem:[%s8188_s3 + $0x40] sm:$0xff] }
 0x1b7   :  { %6178 = vmatpush3.bf16.msra.mxu1 %v7066_v0  ;;  %6238 = vmatpush3.bf16.msra.mxu0 %v6235_v40  ;;  %v4990_v0 = vld [vmem:[%s8188_s3 + $0x3f0] sm:$0xff]  ;;  %v815_v40 = vld [vmem:[%s8188_s3 + $0x28] sm:$0xff] }
 0x1b8   :  { %6180 = vmatprep.subr.bf16.mxu1 %v7072_v34  ;;  %6240 = vmatprep.subr.bf16.mxu0 %v7091_v6  ;;  %v7118_v15 = vpack.c.bf16 %v6642_v7, %v6641_v10  ;;  %v6243_v48 = vpack.c.bf16 %v6627_v19, %v6626_v38  ;;  %v819_v7 = vld [vmem:[%s8188_s3 + $0x48] sm:$0xff]  ;;  %v5019_v10 = vld [vmem:[%s8188_s3 + $0x458] sm:$0xff] }
 0x1b9   :  { %5631 = vmatprep.mubr.msk.f32.mxu1 %vm251_vm0, %v4770_v60  ;;  %5858 = vmatprep.mubr.msk.f32.mxu0 %vm251_vm0, %v4980_v12  ;;  %v6650_v36 = vpop.permute.xlu0 %6649  ;;  %v820_v60 = vld [vmem:[%s8188_s3 + $0x50] sm:$0xff]  ;;  %v5020_v12 = vld [vmem:[%s8188_s3 + $0x460] sm:$0xff] }
 0x1ba   :  { %5632 = vmatmul.mubr.msk.f32.gmra.mrb[42].mxu1 %vm251_vm0, %v4771_v13  ;;  %5859 = vmatmul.mubr.msk.f32.gmra.mrb[28].mxu0 %vm251_vm0, %v4981_v8  ;;  %v6652_v49 = vunpack.i.h.bf16 %v6650_v36  ;;  %v6651_v50 = vunpack.i.l.bf16 %v6650_v36  ;;  %v821_v13 = vld [vmem:[%s8188_s3 + $0x58] sm:$0xff]  ;;  %v5021_v8 = vld [vmem:[%s8188_s3 + $0x468] sm:$0xff] }
 0x1bb   :  { %6182 = vmatpush3.bf16.msra.mxu1 %v7072_v34  ;;  %5634 = vmatprep.mubr.msk.f32.mxu1 %vm251_vm0, %v4772_v56  ;;  %v5008_v34 = vld [vmem:[%s8188_s3 + $0x400] sm:$0xff] }
 0x1bc   :  { %6184 = vmatprep.subr.bf16.mxu1 %v7118_v15  ;;  %5861 = vmatprep.mubr.msk.f32.mxu0 %vm251_vm0, %v4982_v14  ;;  %v6187_v23 = vpack.c.bf16 %v6652_v49, %v6651_v50  ;;  %v822_v56 = vld [vmem:[%s8188_s3 + $0x60] sm:$0xff]  ;;  %v5022_v14 = vld [vmem:[%s8188_s3 + $0x470] sm:$0xff]  ;;  %v4821_v49 = vld [vmem:[%s8188_s3 + $0x128] sm:$0xff] }
 0x1bd   :  { %v6660_v52 = vpop.permute.xlu0 %6659  ;;  %v5047_v50 = vld [vmem:[%s8188_s3 + $0x4b8] sm:$0xff] }
 0x1be   :  { %5635 = vmatmul.mubr.msk.f32.gmra.mrb[44].mxu1 %vm251_vm0, %v4773_v16  ;;  %5862 = vmatmul.mubr.msk.f32.gmra.mrb[30].mxu0 %vm251_vm0, %v4983_v17  ;;  %v6662_v57 = vunpack.i.h.bf16 %v6660_v52  ;;  %v6661_v35 = vunpack.i.l.bf16 %v6660_v52  ;;  %v823_v16 = vld [vmem:[%s8188_s3 + $0x68] sm:$0xff]  ;;  %v5023_v17 = vld [vmem:[%s8188_s3 + $0x478] sm:$0xff]  ;;  %v4822_v52 = vld [vmem:[%s8188_s3 + $0x130] sm:$0xff] }
 0x1bf   :  { %5637 = vmatprep.mubr.msk.f32.mxu1 %vm251_vm0, %v4774_v18  ;;  %5864 = vmatprep.mubr.msk.f32.mxu0 %vm251_vm0, %v4984_v3  ;;  %v824_v18 = vld [vmem:[%s8188_s3 + $0x70] sm:$0xff]  ;;  %v5040_v3 = vld [vmem:[%s8188_s3 + $0x480] sm:$0xff] }
 0x1c0   :  { %v7257_v30 = vpack.c.bf16 %v6662_v57, %v6661_v35  ;;  %v5050_v57 = vld [vmem:[%s8188_s3 + $0x4d0] sm:$0xff]  ;;  %v4825_v35 = vld [vmem:[%s8188_s3 + $0x148] sm:$0xff] }
 0x1c2   :  { %5638 = vmatmul.mubr.msk.f32.gmra.mrb[46].mxu1 %vm251_vm0, %v4775_v11  ;;  %5865 = vmatmul.mubr.msk.f32.gmra.mrb[32].mxu0 %vm251_vm0, %v4985_v20 }
 0x1c3   :  { %5640 = vmatprep.mubr.msk.f32.mxu1 %vm251_vm0, %v4776_v21  ;;  %5867 = vmatprep.mubr.msk.f32.mxu0 %vm251_vm0, %v4986_v22  ;;  %v6670_v21 = vpop.permute.xlu0 %6669 }
 0x1c4   :  { %v6671_v31 = vunpack.i.l.bf16 %v6670_v21 }
 0x1c6   :  { %5641 = vmatmul.mubr.msk.f32.gmra.mrb[48].mxu1 %vm251_vm0, %v4777_v42  ;;  %5868 = vmatmul.mubr.msk.f32.gmra.mrb[34].mxu0 %vm251_vm0, %v4987_v25  ;;  %v825_v42 = vld [vmem:[%s8188_s3 + $0x78] sm:$0xff]  ;;  %v5041_v25 = vld [vmem:[%s8188_s3 + $0x488] sm:$0xff] }
 0x1c7   :  { %5643 = vmatprep.mubr.msk.f32.mxu1 %vm251_vm0, %v4778_v24  ;;  %5870 = vmatprep.mubr.msk.f32.mxu0 %vm251_vm0, %v4988_v26  ;;  %v4816_v24 = vld [vmem:[%s8188_s3 + $0x100] sm:$0xff] }
 0x1ca   :  { %5644 = vmatmul.mubr.msk.f32.gmra.mrb[50].mxu1 %vm251_vm0, %v4779_v27  ;;  %5871 = vmatmul.mubr.msk.f32.gmra.mrb[36].mxu0 %vm251_vm0, %v4989_v63  ;;  %v5042_v27 = vld [vmem:[%s8188_s3 + $0x490] sm:$0xff] }
 0x1cb   :  { %5646 = vmatprep.mubr.msk.f32.mxu1 %vm251_vm0, %v4780_v9  ;;  %5873 = vmatprep.mubr.msk.f32.mxu0 %vm251_vm0, %v4990_v0  ;;  %v6672_v0 = vunpack.i.h.bf16 %v6670_v21 }
 0x1cd   :  { %v6195_v36 = vpack.c.bf16 %v6672_v0, %v6671_v31  ;;  %v4853_v0 = vld [vmem:[%s8188_s3 + $0x1a8] sm:$0xff]  ;;  %v5079_v31 = vld [vmem:[%s8188_s3 + $0x538] sm:$0xff] }
 0x1ce   :  { %5647 = vmatmul.mubr.msk.f32.gmra.mrb[52].mxu1 %vm251_vm0, %v4781_v32  ;;  %5874 = vmatmul.mubr.msk.f32.gmra.mrb[38].mxu0 %vm251_vm0, %v4991_v29  ;;  %v6680_v32 = vpop.permute.xlu0 %6679  ;;  %v4817_v29 = vld [vmem:[%s8188_s3 + $0x108] sm:$0xff] }
 0x1cf   :  { %5649 = vmatprep.mubr.msk.f32.mxu1 %vm251_vm0, %v4782_v4  ;;  %5884 = vmatprep.mubr.msk.f32.mxu0 %vm251_vm0, %v5008_v34  ;;  %v5043_v4 = vld [vmem:[%s8188_s3 + $0x498] sm:$0xff]  ;;  %v6682_v19 = vunpack.i.h.bf16 %v6680_v32  ;;  %v6681_v38 = vunpack.i.l.bf16 %v6680_v32  ;;  %v4854_v32 = vld [vmem:[%s8188_s3 + $0x1b0] sm:$0xff] }
 0x1d2   :  { %5650 = vmatmul.mubr.msk.f32.gmra.mrb[54].mxu1 %vm251_vm0, %v4783_v39  ;;  %5885 = vmatmul.mubr.msk.f32.vlgmr.msra.gmra.mrb[24].mxu0 %vm251_vm0, %v5009_v41  ;;  %v4818_v39 = vld [vmem:[%s8188_s3 + $0x110] sm:$0xff]  ;;  %v5044_v41 = vld [vmem:[%s8188_s3 + $0x4a0] sm:$0xff] }
 0x1d3   :  { %6242 = vmatpush3.bf16.msra.mxu0 %v7091_v6  ;;  %5660 = vmatprep.mubr.msk.f32.mxu1 %vm251_vm0, %v810_v43  ;;  %v5018_v6 = vld [vmem:[%s8188_s3 + $0x450] sm:$0xff]  ;;  %v4819_v43 = vld [vmem:[%s8188_s3 + $0x118] sm:$0xff] }
 0x1d4   :  { %6244 = vmatprep.subr.bf16.mxu0 %v6243_v48  ;;  %5887 = vmatprep.mubr.msk.f32.mxu0 %vm251_vm0, %v5010_v47  ;;  %v4820_v47 = vld [vmem:[%s8188_s3 + $0x120] sm:$0xff] }
 0x1d6   :  { %5661 = vmatmul.mubr.msk.f32.vlgmr.msra.gmra.mrb[40].mxu1 %vm251_vm0, %v811_v53  ;;  %5888 = vmatmul.mubr.msk.f32.gmra.mrb[26].mxu0 %vm251_vm0, %v5011_v55  ;;  %v5048_v53 = vld [vmem:[%s8188_s3 + $0x4c0] sm:$0xff]  ;;  %v4823_v55 = vld [vmem:[%s8188_s3 + $0x138] sm:$0xff] }
 0x1d7   :  { %6186 = vmatpush3.bf16.msra.mxu1 %v7118_v15  ;;  %6246 = vmatpush3.bf16.msra.mxu0 %v6243_v48  ;;  %v6635_v15 = vpop.permute.xlu1 %6634  ;;  %v7393_v48 = vpack.c.bf16 %v6682_v19, %v6681_v38  ;;  %v5082_v19 = vld [vmem:[%s8188_s3 + $0x550] sm:$0xff]  ;;  %v4857_v38 = vld [vmem:[%s8188_s3 + $0x1c8] sm:$0xff] }
 0x1d8   :  { %6188 = vmatprep.subr.bf16.mxu1 %v6187_v23  ;;  %6248 = vmatprep.subr.bf16.mxu0 %v7231_v44  ;;  %v6637_v11 = vunpack.i.h.bf16 %v6635_v15  ;;  %v6636_v20 = vunpack.i.l.bf16 %v6635_v15 }
 0x1d9   :  { %5663 = vmatprep.mubr.msk.f32.mxu1 %vm251_vm0, %v812_v28  ;;  %5890 = vmatprep.mubr.msk.f32.mxu0 %vm251_vm0, %v5012_v58  ;;  %v5051_v28 = vld [vmem:[%s8188_s3 + $0x4d8] sm:$0xff]  ;;  %v4826_v58 = vld [vmem:[%s8188_s3 + $0x150] sm:$0xff] }
 0x1da   :  { %5664 = vmatmul.mubr.msk.f32.gmra.mrb[42].mxu1 %vm251_vm0, %v813_v59  ;;  %5891 = vmatmul.mubr.msk.f32.gmra.mrb[28].mxu0 %vm251_vm0, %v5013_v37  ;;  %v6251_v26 = vpack.c.bf16 %v6637_v11, %v6636_v20  ;;  %v5052_v59 = vld [vmem:[%s8188_s3 + $0x4e0] sm:$0xff]  ;;  %v4827_v37 = vld [vmem:[%s8188_s3 + $0x158] sm:$0xff] }
 0x1db   :  { %6190 = vmatpush3.bf16.msra.mxu1 %v6187_v23  ;;  %5666 = vmatprep.mubr.msk.f32.mxu1 %vm251_vm0, %v814_v46  ;;  %v6645_v22 = vpop.permute.xlu1 %6644  ;;  %v4824_v23 = vld [vmem:[%s8188_s3 + $0x140] sm:$0xff]  ;;  %v5053_v46 = vld [vmem:[%s8188_s3 + $0x4e8] sm:$0xff] }
 0x1dc   :  { %6192 = vmatprep.subr.bf16.mxu1 %v7257_v30  ;;  %5893 = vmatprep.mubr.msk.f32.mxu0 %vm251_vm0, %v5014_v61  ;;  %v6647_v63 = vunpack.i.h.bf16 %v6645_v22  ;;  %v6646_v9 = vunpack.i.l.bf16 %v6645_v22  ;;  %v4828_v61 = vld [vmem:[%s8188_s3 + $0x160] sm:$0xff] }
 0x1de   :  { %5667 = vmatmul.mubr.msk.f32.gmra.mrb[44].mxu1 %vm251_vm0, %v815_v40  ;;  %5894 = vmatmul.mubr.msk.f32.gmra.mrb[30].mxu0 %vm251_vm0, %v5015_v62  ;;  %v7367_v34 = vpack.c.bf16 %v6647_v63, %v6646_v9  ;;  %v4829_v62 = vld [vmem:[%s8188_s3 + $0x168] sm:$0xff]  ;;  %v5078_v63 = vld [vmem:[%s8188_s3 + $0x530] sm:$0xff] }
 0x1df   :  { %5669 = vmatprep.mubr.msk.f32.mxu1 %vm251_vm0, %v816_v33  ;;  %5896 = vmatprep.mubr.msk.f32.mxu0 %vm251_vm0, %v5016_v51  ;;  %v6655_v40 = vpop.permute.xlu1 %6654  ;;  %v5055_v33 = vld [vmem:[%s8188_s3 + $0x4f8] sm:$0xff]  ;;  %v4830_v51 = vld [vmem:[%s8188_s3 + $0x170] sm:$0xff] }
 0x1e2   :  { %5670 = vmatmul.mubr.msk.f32.gmra.mrb[46].mxu1 %vm251_vm0, %v817_v1  ;;  %5897 = vmatmul.mubr.msk.f32.gmra.mrb[32].mxu0 %vm251_vm0, %v5017_v2  ;;  %v5072_v1 = vld [vmem:[%s8188_s3 + $0x500] sm:$0xff]  ;;  %v6657_v2 = vunpack.i.h.bf16 %v6655_v40 }
 0x1e3   :  { %5672 = vmatprep.mubr.msk.f32.mxu1 %vm251_vm0, %v818_v5  ;;  %5899 = vmatprep.mubr.msk.f32.mxu0 %vm251_vm0, %v5018_v6  ;;  %v6656_v5 = vunpack.i.l.bf16 %v6655_v40  ;;  %v6690_v6 = vpop.permute.xlu0 %6689 }
 0x1e4   :  { %v6692_v15 = vunpack.i.h.bf16 %v6690_v6 }
 0x1e6   :  { %5673 = vmatmul.mubr.msk.f32.gmra.mrb[48].mxu1 %vm251_vm0, %v819_v7  ;;  %5900 = vmatmul.mubr.msk.f32.gmra.mrb[34].mxu0 %vm251_vm0, %v5019_v10  ;;  %v6665_v7 = vpop.permute.xlu1 %6664  ;;  %v4831_v10 = vld [vmem:[%s8188_s3 + $0x178] sm:$0xff] }
 0x1e7   :  { %5675 = vmatprep.mubr.msk.f32.mxu1 %vm251_vm0, %v820_v60  ;;  %5902 = vmatprep.mubr.msk.f32.mxu0 %vm251_vm0, %v5020_v12  ;;  %v5073_v60 = vld [vmem:[%s8188_s3 + $0x508] sm:$0xff]  ;;  %v4848_v12 = vld [vmem:[%s8188_s3 + $0x180] sm:$0xff] }
 0x1ea   :  { %5676 = vmatmul.mubr.msk.f32.gmra.mrb[50].mxu1 %vm251_vm0, %v821_v13  ;;  %5903 = vmatmul.mubr.msk.f32.gmra.mrb[36].mxu0 %vm251_vm0, %v5021_v8  ;;  %v6259_v13 = vpack.c.bf16 %v6657_v2, %v6656_v5  ;;  %v5074_v8 = vld [vmem:[%s8188_s3 + $0x510] sm:$0xff] }
 0x1eb   :  { %5678 = vmatprep.mubr.msk.f32.mxu1 %vm251_vm0, %v822_v56  ;;  %5905 = vmatprep.mubr.msk.f32.mxu0 %vm251_vm0, %v5022_v14  ;;  %v6667_v56 = vunpack.i.h.bf16 %v6665_v7  ;;  %v6666_v14 = vunpack.i.l.bf16 %v6665_v7 }
 0x1ed   :  { %v7503_v11 = vpack.c.bf16 %v6667_v56, %v6666_v14  ;;  %v5110_v56 = vld [vmem:[%s8188_s3 + $0x5b0] sm:$0xff] }
 0x1ee   :  { %5679 = vmatmul.mubr.msk.f32.gmra.mrb[52].mxu1 %vm251_vm0, %v823_v16  ;;  %5906 = vmatmul.mubr.msk.f32.gmra.mrb[38].mxu0 %vm251_vm0, %v5023_v17  ;;  %v6691_v16 = vunpack.i.l.bf16 %v6690_v6  ;;  %v6700_v17 = vpop.permute.xlu0 %6699 }
 0x1ef   :  { %5681 = vmatprep.mubr.msk.f32.mxu1 %vm251_vm0, %v824_v18  ;;  %5916 = vmatprep.mubr.msk.f32.mxu0 %vm251_vm0, %v5040_v3  ;;  %v4849_v18 = vld [vmem:[%s8188_s3 + $0x188] sm:$0xff]  ;;  %v5075_v3 = vld [vmem:[%s8188_s3 + $0x518] sm:$0xff]  ;;  %v6702_v21 = vunpack.i.h.bf16 %v6700_v17  ;;  %v6701_v22 = vunpack.i.l.bf16 %v6700_v17  ;;  %v4886_v17 = vld [vmem:[%s8188_s3 + $0x230] sm:$0xff] }
 0x1f0   :  { %v6203_v20 = vpack.c.bf16 %v6692_v15, %v6691_v16  ;;  %v4885_v15 = vld [vmem:[%s8188_s3 + $0x228] sm:$0xff]  ;;  %v5111_v16 = vld [vmem:[%s8188_s3 + $0x5b8] sm:$0xff] }
 0x1f1   :  { %v7529_v9 = vpack.c.bf16 %v6702_v21, %v6701_v22  ;;  %v5114_v21 = vld [vmem:[%s8188_s3 + $0x5d0] sm:$0xff]  ;;  %v4889_v22 = vld [vmem:[%s8188_s3 + $0x248] sm:$0xff] }
 0x1f2   :  { %5682 = vmatmul.mubr.msk.f32.gmra.mrb[54].mxu1 %vm251_vm0, %v825_v42  ;;  %5917 = vmatmul.mubr.msk.f32.vlgmr.msra.gmra.mrb[24].mxu0 %vm251_vm0, %v5041_v25  ;;  %v4850_v42 = vld [vmem:[%s8188_s3 + $0x190] sm:$0xff]  ;;  %v5076_v25 = vld [vmem:[%s8188_s3 + $0x520] sm:$0xff] }
 0x1f3   :  { %6250 = vmatpush3.bf16.msra.mxu0 %v7231_v44  ;;  %5692 = vmatprep.mubr.msk.f32.mxu1 %vm251_vm0, %v4816_v24  ;;  %v5049_v44 = vld [vmem:[%s8188_s3 + $0x4c8] sm:$0xff]  ;;  %v4851_v24 = vld [vmem:[%s8188_s3 + $0x198] sm:$0xff] }
 0x1f4   :  { %6252 = vmatprep.subr.bf16.mxu0 %v6251_v26  ;;  %5919 = vmatprep.mubr.msk.f32.mxu0 %vm251_vm0, %v5042_v27  ;;  %v4852_v27 = vld [vmem:[%s8188_s3 + $0x1a0] sm:$0xff] }
 0x1f6   :  { %5693 = vmatmul.mubr.msk.f32.vlgmr.msra.gmra.mrb[40].mxu1 %vm251_vm0, %v4817_v29  ;;  %5920 = vmatmul.mubr.msk.f32.gmra.mrb[26].mxu0 %vm251_vm0, %v5043_v4  ;;  %v5080_v29 = vld [vmem:[%s8188_s3 + $0x540] sm:$0xff]  ;;  %v4855_v4 = vld [vmem:[%s8188_s3 + $0x1b8] sm:$0xff] }
 0x1f7   :  { %6194 = vmatpush3.bf16.msra.mxu1 %v7257_v30  ;;  %6254 = vmatpush3.bf16.msra.mxu0 %v6251_v26  ;;  %v5054_v30 = vld [vmem:[%s8188_s3 + $0x4f0] sm:$0xff]  ;;  %v5077_v26 = vld [vmem:[%s8188_s3 + $0x528] sm:$0xff] }
 0x1f8   :  { %6196 = vmatprep.subr.bf16.mxu1 %v6195_v36  ;;  %6256 = vmatprep.subr.bf16.mxu0 %v7367_v34 }
 0x1f9   :  { %5695 = vmatprep.mubr.msk.f32.mxu1 %vm251_vm0, %v4818_v39  ;;  %5922 = vmatprep.mubr.msk.f32.mxu0 %vm251_vm0, %v5044_v41  ;;  %v5083_v39 = vld [vmem:[%s8188_s3 + $0x558] sm:$0xff]  ;;  %v4858_v41 = vld [vmem:[%s8188_s3 + $0x1d0] sm:$0xff] }
 0x1fa   :  { %5696 = vmatmul.mubr.msk.f32.gmra.mrb[42].mxu1 %vm251_vm0, %v4819_v43  ;;  %5923 = vmatmul.mubr.msk.f32.gmra.mrb[28].mxu0 %vm251_vm0, %v5045_v45  ;;  %v5084_v43 = vld [vmem:[%s8188_s3 + $0x560] sm:$0xff]  ;;  %v4859_v45 = vld [vmem:[%s8188_s3 + $0x1d8] sm:$0xff] }
 0x1fb   :  { %6198 = vmatpush3.bf16.msra.mxu1 %v6195_v36  ;;  %5698 = vmatprep.mubr.msk.f32.mxu1 %vm251_vm0, %v4820_v47  ;;  %v4856_v36 = vld [vmem:[%s8188_s3 + $0x1c0] sm:$0xff]  ;;  %v5085_v47 = vld [vmem:[%s8188_s3 + $0x568] sm:$0xff] }
 0x1fc   :  { %6200 = vmatprep.subr.bf16.mxu1 %v7393_v48  ;;  %5925 = vmatprep.mubr.msk.f32.mxu0 %vm251_vm0, %v5046_v54  ;;  %v4860_v54 = vld [vmem:[%s8188_s3 + $0x1e0] sm:$0xff] }
 0x1fe   :  { %5699 = vmatmul.mubr.msk.f32.gmra.mrb[44].mxu1 %vm251_vm0, %v4821_v49  ;;  %5926 = vmatmul.mubr.msk.f32.gmra.mrb[30].mxu0 %vm251_vm0, %v5047_v50  ;;  %v6675_v49 = vpop.permute.xlu1 %6674  ;;  %v4861_v50 = vld [vmem:[%s8188_s3 + $0x1e8] sm:$0xff] }
 0x1ff   :  { %5701 = vmatprep.mubr.msk.f32.mxu1 %vm251_vm0, %v4822_v52  ;;  %5928 = vmatprep.mubr.msk.f32.mxu0 %vm251_vm0, %v5048_v53  ;;  %v5087_v52 = vld [vmem:[%s8188_s3 + $0x578] sm:$0xff]  ;;  %v4862_v53 = vld [vmem:[%s8188_s3 + $0x1f0] sm:$0xff] }
 0x202   :  { %5702 = vmatmul.mubr.msk.f32.gmra.mrb[46].mxu1 %vm251_vm0, %v4823_v55  ;;  %5929 = vmatmul.mubr.msk.f32.gmra.mrb[32].mxu0 %vm251_vm0, %v5049_v44  ;;  %v5104_v55 = vld [vmem:[%s8188_s3 + $0x580] sm:$0xff]  ;;  %v6677_v44 = vunpack.i.h.bf16 %v6675_v49 }
 0x203   :  { %5704 = vmatprep.mubr.msk.f32.mxu1 %vm251_vm0, %v4824_v23  ;;  %5931 = vmatprep.mubr.msk.f32.mxu0 %vm251_vm0, %v5050_v57  ;;  %v6676_v23 = vunpack.i.l.bf16 %v6675_v49  ;;  %v6710_v57 = vpop.permute.xlu0 %6709 }
 0x204   :  { %v6712_v40 = vunpack.i.h.bf16 %v6710_v57 }
 0x206   :  { %5705 = vmatmul.mubr.msk.f32.gmra.mrb[48].mxu1 %vm251_vm0, %v4825_v35  ;;  %5932 = vmatmul.mubr.msk.f32.gmra.mrb[34].mxu0 %vm251_vm0, %v5051_v28  ;;  %v6685_v35 = vpop.permute.xlu1 %6684  ;;  %v4863_v28 = vld [vmem:[%s8188_s3 + $0x1f8] sm:$0xff] }
 0x207   :  { %5707 = vmatprep.mubr.msk.f32.mxu1 %vm251_vm0, %v4826_v58  ;;  %5934 = vmatprep.mubr.msk.f32.mxu0 %vm251_vm0, %v5052_v59  ;;  %v5105_v58 = vld [vmem:[%s8188_s3 + $0x588] sm:$0xff]  ;;  %v4880_v59 = vld [vmem:[%s8188_s3 + $0x200] sm:$0xff] }
 0x20a   :  { %5708 = vmatmul.mubr.msk.f32.gmra.mrb[50].mxu1 %vm251_vm0, %v4827_v37  ;;  %5935 = vmatmul.mubr.msk.f32.gmra.mrb[36].mxu0 %vm251_vm0, %v5053_v46  ;;  %v6267_v37 = vpack.c.bf16 %v6677_v44, %v6676_v23  ;;  %v5106_v46 = vld [vmem:[%s8188_s3 + $0x590] sm:$0xff] }
 0x20b   :  { %5710 = vmatprep.mubr.msk.f32.mxu1 %vm251_vm0, %v4828_v61  ;;  %5937 = vmatprep.mubr.msk.f32.mxu0 %vm251_vm0, %v5054_v30  ;;  %v6687_v61 = vunpack.i.h.bf16 %v6685_v35  ;;  %v6686_v30 = vunpack.i.l.bf16 %v6685_v35  ;;  %v4914_v23 = vld [vmem:[%s8188_s3 + $0x290] sm:$0xff]  ;;  %v4915_v35 = vld [vmem:[%s8188_s3 + $0x298] sm:$0xff] }
 0x20d   :  { %v7639_v2 = vpack.c.bf16 %v6687_v61, %v6686_v30  ;;  %v4918_v61 = vld [vmem:[%s8188_s3 + $0x2b0] sm:$0xff]  ;;  %v5144_v30 = vld [vmem:[%s8188_s3 + $0x640] sm:$0xff] }
 0x20e   :  { %5711 = vmatmul.mubr.msk.f32.gmra.mrb[52].mxu1 %vm251_vm0, %v4829_v62  ;;  %5938 = vmatmul.mubr.msk.f32.gmra.mrb[38].mxu0 %vm251_vm0, %v5055_v33  ;;  %v6711_v62 = vunpack.i.l.bf16 %v6710_v57  ;;  %v6720_v33 = vpop.permute.xlu0 %6719  ;;  %v5140_v57 = vld [vmem:[%s8188_s3 + $0x620] sm:$0xff] }
 0x20f   :  { %5713 = vmatprep.mubr.msk.f32.mxu1 %vm251_vm0, %v4830_v51  ;;  %5948 = vmatprep.mubr.msk.f32.mxu0 %vm251_vm0, %v5072_v1  ;;  %v4881_v51 = vld [vmem:[%s8188_s3 + $0x208] sm:$0xff]  ;;  %v5107_v1 = vld [vmem:[%s8188_s3 + $0x598] sm:$0xff]  ;;  %v6722_v6 = vunpack.i.h.bf16 %v6720_v33  ;;  %v6721_v7 = vunpack.i.l.bf16 %v6720_v33  ;;  %v4920_v33 = vld [vmem:[%s8188_s3 + $0x2c0] sm:$0xff] }
 0x210   :  { %v6211_v5 = vpack.c.bf16 %v6712_v40, %v6711_v62  ;;  %v4919_v40 = vld [vmem:[%s8188_s3 + $0x2b8] sm:$0xff]  ;;  %v5145_v62 = vld [vmem:[%s8188_s3 + $0x648] sm:$0xff] }
 0x211   :  { %v7665_v14 = vpack.c.bf16 %v6722_v6, %v6721_v7  ;;  %v5148_v6 = vld [vmem:[%s8188_s3 + $0x660] sm:$0xff]  ;;  %v4923_v7 = vld [vmem:[%s8188_s3 + $0x2d8] sm:$0xff] }
 0x212   :  { %5714 = vmatmul.mubr.msk.f32.gmra.mrb[54].mxu1 %vm251_vm0, %v4831_v10  ;;  %5949 = vmatmul.mubr.msk.f32.vlgmr.msra.gmra.mrb[24].mxu0 %vm251_vm0, %v5073_v60  ;;  %v4882_v10 = vld [vmem:[%s8188_s3 + $0x210] sm:$0xff]  ;;  %v5108_v60 = vld [vmem:[%s8188_s3 + $0x5a0] sm:$0xff] }
 0x213   :  { %6258 = vmatpush3.bf16.msra.mxu0 %v7367_v34  ;;  %5724 = vmatprep.mubr.msk.f32.mxu1 %vm251_vm0, %v4848_v12  ;;  %v5081_v34 = vld [vmem:[%s8188_s3 + $0x548] sm:$0xff]  ;;  %v4883_v12 = vld [vmem:[%s8188_s3 + $0x218] sm:$0xff] }
 0x214   :  { %6260 = vmatprep.subr.bf16.mxu0 %v6259_v13  ;;  %5951 = vmatprep.mubr.msk.f32.mxu0 %vm251_vm0, %v5074_v8  ;;  %v4884_v8 = vld [vmem:[%s8188_s3 + $0x220] sm:$0xff] }
 0x216   :  { %5725 = vmatmul.mubr.msk.f32.vlgmr.msra.gmra.mrb[40].mxu1 %vm251_vm0, %v4849_v18  ;;  %5952 = vmatmul.mubr.msk.f32.gmra.mrb[26].mxu0 %vm251_vm0, %v5075_v3  ;;  %v5112_v18 = vld [vmem:[%s8188_s3 + $0x5c0] sm:$0xff]  ;;  %v4887_v3 = vld [vmem:[%s8188_s3 + $0x238] sm:$0xff] }
 0x217   :  { %6202 = vmatpush3.bf16.msra.mxu1 %v7393_v48  ;;  %6262 = vmatpush3.bf16.msra.mxu0 %v6259_v13  ;;  %v5086_v48 = vld [vmem:[%s8188_s3 + $0x570] sm:$0xff]  ;;  %v5109_v13 = vld [vmem:[%s8188_s3 + $0x5a8] sm:$0xff] }
 0x218   :  { %6204 = vmatprep.subr.bf16.mxu1 %v6203_v20  ;;  %6264 = vmatprep.subr.bf16.mxu0 %v7503_v11 }
 0x219   :  { %5727 = vmatprep.mubr.msk.f32.mxu1 %vm251_vm0, %v4850_v42  ;;  %5954 = vmatprep.mubr.msk.f32.mxu0 %vm251_vm0, %v5076_v25  ;;  %v5115_v42 = vld [vmem:[%s8188_s3 + $0x5d8] sm:$0xff]  ;;  %v4890_v25 = vld [vmem:[%s8188_s3 + $0x250] sm:$0xff] }
 0x21a   :  { %5728 = vmatmul.mubr.msk.f32.gmra.mrb[42].mxu1 %vm251_vm0, %v4851_v24  ;;  %5955 = vmatmul.mubr.msk.f32.gmra.mrb[28].mxu0 %vm251_vm0, %v5077_v26  ;;  %v5116_v24 = vld [vmem:[%s8188_s3 + $0x5e0] sm:$0xff]  ;;  %v4891_v26 = vld [vmem:[%s8188_s3 + $0x258] sm:$0xff] }
 0x21b   :  { %6206 = vmatpush3.bf16.msra.mxu1 %v6203_v20  ;;  %5730 = vmatprep.mubr.msk.f32.mxu1 %vm251_vm0, %v4852_v27  ;;  %v4888_v20 = vld [vmem:[%s8188_s3 + $0x240] sm:$0xff]  ;;  %v5117_v27 = vld [vmem:[%s8188_s3 + $0x5e8] sm:$0xff] }
 0x21c   :  { %6208 = vmatprep.subr.bf16.mxu1 %v7529_v9  ;;  %5957 = vmatprep.mubr.msk.f32.mxu0 %vm251_vm0, %v5078_v63  ;;  %v4892_v63 = vld [vmem:[%s8188_s3 + $0x260] sm:$0xff] }
 0x21e   :  { %5731 = vmatmul.mubr.msk.f32.gmra.mrb[44].mxu1 %vm251_vm0, %v4853_v0  ;;  %5958 = vmatmul.mubr.msk.f32.gmra.mrb[30].mxu0 %vm251_vm0, %v5079_v31  ;;  %v6695_v0 = vpop.permute.xlu1 %6694  ;;  %v4893_v31 = vld [vmem:[%s8188_s3 + $0x268] sm:$0xff] }
 0x21f   :  { %5733 = vmatprep.mubr.msk.f32.mxu1 %vm251_vm0, %v4854_v32  ;;  %5960 = vmatprep.mubr.msk.f32.mxu0 %vm251_vm0, %v5080_v29  ;;  %v5119_v32 = vld [vmem:[%s8188_s3 + $0x5f8] sm:$0xff]  ;;  %v4894_v29 = vld [vmem:[%s8188_s3 + $0x270] sm:$0xff] }
 0x222   :  { %5734 = vmatmul.mubr.msk.f32.gmra.mrb[46].mxu1 %vm251_vm0, %v4855_v4  ;;  %5961 = vmatmul.mubr.msk.f32.gmra.mrb[32].mxu0 %vm251_vm0, %v5081_v34  ;;  %v5136_v4 = vld [vmem:[%s8188_s3 + $0x600] sm:$0xff]  ;;  %v6697_v34 = vunpack.i.h.bf16 %v6695_v0 }
 0x223   :  { %5736 = vmatprep.mubr.msk.f32.mxu1 %vm251_vm0, %v4856_v36  ;;  %5963 = vmatprep.mubr.msk.f32.mxu0 %vm251_vm0, %v5082_v19  ;;  %v6696_v36 = vunpack.i.l.bf16 %v6695_v0  ;;  %v6705_v19 = vpop.permute.xlu1 %6704  ;;  %v4947_v0 = vld [vmem:[%s8188_s3 + $0x318] sm:$0xff] }
 0x226   :  { %5737 = vmatmul.mubr.msk.f32.gmra.mrb[48].mxu1 %vm251_vm0, %v4857_v38  ;;  %5964 = vmatmul.mubr.msk.f32.gmra.mrb[34].mxu0 %vm251_vm0, %v5083_v39  ;;  %v6730_v38 = vpop.permute.xlu0 %6729  ;;  %v4895_v39 = vld [vmem:[%s8188_s3 + $0x278] sm:$0xff] }
 0x227   :  { %5739 = vmatprep.mubr.msk.f32.mxu1 %vm251_vm0, %v4858_v41  ;;  %5966 = vmatprep.mubr.msk.f32.mxu0 %vm251_vm0, %v5084_v43  ;;  %v5137_v41 = vld [vmem:[%s8188_s3 + $0x608] sm:$0xff]  ;;  %v4912_v43 = vld [vmem:[%s8188_s3 + $0x280] sm:$0xff]  ;;  %v6732_v49 = vunpack.i.h.bf16 %v6730_v38 }
 0x22a   :  { %5740 = vmatmul.mubr.msk.f32.gmra.mrb[50].mxu1 %vm251_vm0, %v4859_v45  ;;  %5967 = vmatmul.mubr.msk.f32.gmra.mrb[36].mxu0 %vm251_vm0, %v5085_v47  ;;  %v6275_v45 = vpack.c.bf16 %v6697_v34, %v6696_v36  ;;  %v5138_v47 = vld [vmem:[%s8188_s3 + $0x610] sm:$0xff]  ;;  %v5175_v34 = vld [vmem:[%s8188_s3 + $0x6b8] sm:$0xff] }
 0x22b   :  { %5742 = vmatprep.mubr.msk.f32.mxu1 %vm251_vm0, %v4860_v54  ;;  %5969 = vmatprep.mubr.msk.f32.mxu0 %vm251_vm0, %v5086_v48  ;;  %v6707_v54 = vunpack.i.h.bf16 %v6705_v19  ;;  %v6706_v48 = vunpack.i.l.bf16 %v6705_v19  ;;  %v4950_v36 = vld [vmem:[%s8188_s3 + $0x330] sm:$0xff]  ;;  %v5176_v19 = vld [vmem:[%s8188_s3 + $0x6c0] sm:$0xff] }
 0x22e   :  { %5743 = vmatmul.mubr.msk.f32.gmra.mrb[52].mxu1 %vm251_vm0, %v4861_v50  ;;  %5970 = vmatmul.mubr.msk.f32.gmra.mrb[38].mxu0 %vm251_vm0, %v5087_v52  ;;  %v6731_v50 = vunpack.i.l.bf16 %v6730_v38  ;;  %v4913_v52 = vld [vmem:[%s8188_s3 + $0x288] sm:$0xff]  ;;  %v4951_v38 = vld [vmem:[%s8188_s3 + $0x338] sm:$0xff] }
 0x22f   :  { %5745 = vmatprep.mubr.msk.f32.mxu1 %vm251_vm0, %v4862_v53  ;;  %5980 = vmatprep.mubr.msk.f32.mxu0 %vm251_vm0, %v5104_v55  ;;  %v5139_v53 = vld [vmem:[%s8188_s3 + $0x618] sm:$0xff]  ;;  %v7775_v55 = vpack.c.bf16 %v6707_v54, %v6706_v48  ;;  %v4954_v54 = vld [vmem:[%s8188_s3 + $0x350] sm:$0xff]  ;;  %v5180_v48 = vld [vmem:[%s8188_s3 + $0x6e0] sm:$0xff] }
 0x230   :  { %v6219_v44 = vpack.c.bf16 %v6732_v49, %v6731_v50  ;;  %v4955_v49 = vld [vmem:[%s8188_s3 + $0x358] sm:$0xff]  ;;  %v5181_v50 = vld [vmem:[%s8188_s3 + $0x6e8] sm:$0xff] }
 0x232   :  { %5746 = vmatmul.mubr.msk.f32.gmra.mrb[54].mxu1 %vm251_vm0, %v4863_v28  ;;  %5981 = vmatmul.mubr.msk.f32.vlgmr.msra.gmra.mrb[24].mxu0 %vm251_vm0, %v5105_v58  ;;  %v5141_v28 = vld [vmem:[%s8188_s3 + $0x628] sm:$0xff]  ;;  %v4916_v58 = vld [vmem:[%s8188_s3 + $0x2a0] sm:$0xff] }
 0x233   :  { %6266 = vmatpush3.bf16.msra.mxu0 %v7503_v11  ;;  %5756 = vmatprep.mubr.msk.f32.mxu1 %vm251_vm0, %v4880_v59  ;;  %v5113_v11 = vld [vmem:[%s8188_s3 + $0x5c8] sm:$0xff]  ;;  %v5142_v59 = vld [vmem:[%s8188_s3 + $0x630] sm:$0xff] }
 0x234   :  { %6268 = vmatprep.subr.bf16.mxu0 %v6267_v37  ;;  %5983 = vmatprep.mubr.msk.f32.mxu0 %vm251_vm0, %v5106_v46  ;;  %v5143_v46 = vld [vmem:[%s8188_s3 + $0x638] sm:$0xff] }
 0x236   :  { %5757 = vmatmul.mubr.msk.f32.vlgmr.msra.gmra.mrb[40].mxu1 %vm251_vm0, %v4881_v51  ;;  %5984 = vmatmul.mubr.msk.f32.gmra.mrb[26].mxu0 %vm251_vm0, %v5107_v1  ;;  %v5146_v51 = vld [vmem:[%s8188_s3 + $0x650] sm:$0xff]  ;;  %v4921_v1 = vld [vmem:[%s8188_s3 + $0x2c8] sm:$0xff] }
 0x237   :  { %6210 = vmatpush3.bf16.msra.mxu1 %v7529_v9  ;;  %6270 = vmatpush3.bf16.msra.mxu0 %v6267_v37  ;;  %v5118_v9 = vld [vmem:[%s8188_s3 + $0x5f0] sm:$0xff]  ;;  %v4917_v37 = vld [vmem:[%s8188_s3 + $0x2a8] sm:$0xff] }
 0x238   :  { %6212 = vmatprep.subr.bf16.mxu1 %v6211_v5  ;;  %6272 = vmatprep.subr.bf16.mxu0 %v7639_v2 }
 0x239   :  { %5759 = vmatprep.mubr.msk.f32.mxu1 %vm251_vm0, %v4882_v10  ;;  %5986 = vmatprep.mubr.msk.f32.mxu0 %vm251_vm0, %v5108_v60  ;;  %v5149_v10 = vld [vmem:[%s8188_s3 + $0x668] sm:$0xff]  ;;  %v4924_v60 = vld [vmem:[%s8188_s3 + $0x2e0] sm:$0xff] }
 0x23a   :  { %5760 = vmatmul.mubr.msk.f32.gmra.mrb[42].mxu1 %vm251_vm0, %v4883_v12  ;;  %5987 = vmatmul.mubr.msk.f32.gmra.mrb[28].mxu0 %vm251_vm0, %v5109_v13  ;;  %v5150_v12 = vld [vmem:[%s8188_s3 + $0x670] sm:$0xff]  ;;  %v6715_v13 = vpop.permute.xlu1 %6714 }
 0x23b   :  { %6214 = vmatpush3.bf16.msra.mxu1 %v6211_v5  ;;  %5762 = vmatprep.mubr.msk.f32.mxu1 %vm251_vm0, %v4884_v8  ;;  %v4922_v5 = vld [vmem:[%s8188_s3 + $0x2d0] sm:$0xff]  ;;  %v4925_v8 = vld [vmem:[%s8188_s3 + $0x2e8] sm:$0xff] }
 0x23c   :  { %6216 = vmatprep.subr.bf16.mxu1 %v7665_v14  ;;  %5989 = vmatprep.mubr.msk.f32.mxu0 %vm251_vm0, %v5110_v56  ;;  %v5151_v56 = vld [vmem:[%s8188_s3 + $0x678] sm:$0xff] }
 0x23e   :  { %5763 = vmatmul.mubr.msk.f32.gmra.mrb[44].mxu1 %vm251_vm0, %v4885_v15  ;;  %5990 = vmatmul.mubr.msk.f32.gmra.mrb[30].mxu0 %vm251_vm0, %v5111_v16  ;;  %v5168_v15 = vld [vmem:[%s8188_s3 + $0x680] sm:$0xff]  ;;  %v6717_v16 = vunpack.i.h.bf16 %v6715_v13 }
 0x23f   :  { %5765 = vmatprep.mubr.msk.f32.mxu1 %vm251_vm0, %v4886_v17  ;;  %5992 = vmatprep.mubr.msk.f32.mxu0 %vm251_vm0, %v5112_v18  ;;  %v6716_v17 = vunpack.i.l.bf16 %v6715_v13  ;;  %v6725_v18 = vpop.permute.xlu1 %6724  ;;  %v5232_v13 = vld [vmem:[%s8188_s3 + $0x780] sm:$0xff] }
 0x242   :  { %5766 = vmatmul.mubr.msk.f32.gmra.mrb[46].mxu1 %vm251_vm0, %v4887_v3  ;;  %5993 = vmatmul.mubr.msk.f32.gmra.mrb[32].mxu0 %vm251_vm0, %v5113_v11  ;;  %v4927_v3 = vld [vmem:[%s8188_s3 + $0x2f8] sm:$0xff]  ;;  %v5169_v11 = vld [vmem:[%s8188_s3 + $0x688] sm:$0xff] }
 0x243   :  { %5768 = vmatprep.mubr.msk.f32.mxu1 %vm251_vm0, %v4888_v20  ;;  %5995 = vmatprep.mubr.msk.f32.mxu0 %vm251_vm0, %v5114_v21  ;;  %v4944_v20 = vld [vmem:[%s8188_s3 + $0x300] sm:$0xff]  ;;  %v5170_v21 = vld [vmem:[%s8188_s3 + $0x690] sm:$0xff] }
 0x246   :  { %5769 = vmatmul.mubr.msk.f32.gmra.mrb[48].mxu1 %vm251_vm0, %v4889_v22  ;;  %5996 = vmatmul.mubr.msk.f32.gmra.mrb[34].mxu0 %vm251_vm0, %v5115_v42  ;;  %v6283_v22 = vpack.c.bf16 %v6717_v16, %v6716_v17  ;;  %v6727_v42 = vunpack.i.h.bf16 %v6725_v18  ;;  %v5237_v16 = vld [vmem:[%s8188_s3 + $0x7a8] sm:$0xff]  ;;  %v5238_v17 = vld [vmem:[%s8188_s3 + $0x7b0] sm:$0xff] }
 0x247   :  { %5771 = vmatprep.mubr.msk.f32.mxu1 %vm251_vm0, %v4890_v25  ;;  %5998 = vmatprep.mubr.msk.f32.mxu0 %vm251_vm0, %v5116_v24  ;;  %v6726_v25 = vunpack.i.l.bf16 %v6725_v18  ;;  %v4945_v24 = vld [vmem:[%s8188_s3 + $0x308] sm:$0xff]  ;;  %v5239_v18 = vld [vmem:[%s8188_s3 + $0x7b8] sm:$0xff] }
 0x24a   :  { %5772 = vmatmul.mubr.msk.f32.gmra.mrb[50].mxu1 %vm251_vm0, %v4891_v26  ;;  %5999 = vmatmul.mubr.msk.f32.gmra.mrb[36].mxu0 %vm251_vm0, %v5117_v27  ;;  %v5171_v26 = vld [vmem:[%s8188_s3 + $0x698] sm:$0xff]  ;;  %v4946_v27 = vld [vmem:[%s8188_s3 + $0x310] sm:$0xff] }
 0x24b   :  { %5774 = vmatprep.mubr.msk.f32.mxu1 %vm251_vm0, %v4892_v63  ;;  %6001 = vmatprep.mubr.msk.f32.mxu0 %vm251_vm0, %v5118_v9  ;;  %v5172_v63 = vld [vmem:[%s8188_s3 + $0x6a0] sm:$0xff]  ;;  %v7914_v9 = vpack.c.bf16 %v6727_v42, %v6726_v25  ;;  %v5245_v42 = vld [vmem:[%s8188_s3 + $0x7e8] sm:$0xff]  ;;  %v5246_v25 = vld [vmem:[%s8188_s3 + $0x7f0] sm:$0xff] }
 0x24e   :  { %5775 = vmatmul.mubr.msk.f32.gmra.mrb[52].mxu1 %vm251_vm0, %v4893_v31  ;;  %6002 = vmatmul.mubr.msk.f32.gmra.mrb[38].mxu0 %vm251_vm0, %v5119_v32  ;;  %v5173_v31 = vld [vmem:[%s8188_s3 + $0x6a8] sm:$0xff]  ;;  %v4948_v32 = vld [vmem:[%s8188_s3 + $0x320] sm:$0xff] }
 0x24f   :  { %5777 = vmatprep.mubr.msk.f32.mxu1 %vm251_vm0, %v4894_v29  ;;  %6012 = vmatprep.mubr.msk.f32.mxu0 %vm251_vm0, %v5136_v4  ;;  %v5174_v29 = vld [vmem:[%s8188_s3 + $0x6b0] sm:$0xff]  ;;  %v4949_v4 = vld [vmem:[%s8188_s3 + $0x328] sm:$0xff] }
 0x252   :  { %5778 = vmatmul.mubr.msk.f32.gmra.mrb[54].mxu1 %vm251_vm0, %v4895_v39  ;;  %6013 = vmatmul.mubr.msk.f32.vlgmr.msra.gmra.mrb[24].mxu0 %vm251_vm0, %v5137_v41  ;;  %v5177_v39 = vld [vmem:[%s8188_s3 + $0x6c8] sm:$0xff]  ;;  %v4952_v41 = vld [vmem:[%s8188_s3 + $0x340] sm:$0xff] }
 0x253   :  { %6274 = vmatpush3.bf16.msra.mxu0 %v7639_v2  ;;  %5788 = vmatprep.mubr.msk.f32.mxu1 %vm251_vm0, %v4912_v43  ;;  %v5147_v2 = vld [vmem:[%s8188_s3 + $0x658] sm:$0xff]  ;;  %v5178_v43 = vld [vmem:[%s8188_s3 + $0x6d0] sm:$0xff] }
 0x254   :  { %6276 = vmatprep.subr.bf16.mxu0 %v6275_v45  ;;  %6015 = vmatprep.mubr.msk.f32.mxu0 %vm251_vm0, %v5138_v47  ;;  %v5179_v47 = vld [vmem:[%s8188_s3 + $0x6d8] sm:$0xff] }
 0x256   :  { %5789 = vmatmul.mubr.msk.f32.vlgmr.msra.gmra.mrb[40].mxu1 %vm251_vm0, %v4913_v52  ;;  %6016 = vmatmul.mubr.msk.f32.gmra.mrb[26].mxu0 %vm251_vm0, %v5139_v53  ;;  %v4956_v52 = vld [vmem:[%s8188_s3 + $0x360] sm:$0xff]  ;;  %v5182_v53 = vld [vmem:[%s8188_s3 + $0x6f0] sm:$0xff] }
 0x257   :  { %6218 = vmatpush3.bf16.msra.mxu1 %v7665_v14  ;;  %6278 = vmatpush3.bf16.msra.mxu0 %v6275_v45  ;;  %v4926_v14 = vld [vmem:[%s8188_s3 + $0x2f0] sm:$0xff]  ;;  %v4953_v45 = vld [vmem:[%s8188_s3 + $0x348] sm:$0xff] }
 0x258   :  { %6220 = vmatprep.subr.bf16.mxu1 %v6219_v44  ;;  %6280 = vmatprep.subr.bf16.mxu0 %v7775_v55 }
 0x259   :  { %5791 = vmatprep.mubr.msk.f32.mxu1 %vm251_vm0, %v4914_v23  ;;  %6018 = vmatprep.mubr.msk.f32.mxu0 %vm251_vm0, %v5140_v57  ;;  %v5183_v23 = vld [vmem:[%s8188_s3 + $0x6f8] sm:$0xff]  ;;  %v4958_v57 = vld [vmem:[%s8188_s3 + $0x370] sm:$0xff] }
 0x25a   :  { %5792 = vmatmul.mubr.msk.f32.gmra.mrb[42].mxu1 %vm251_vm0, %v4915_v35  ;;  %6019 = vmatmul.mubr.msk.f32.gmra.mrb[28].mxu0 %vm251_vm0, %v5141_v28  ;;  %v5200_v35 = vld [vmem:[%s8188_s3 + $0x700] sm:$0xff] }
 0x25b   :  { %6222 = vmatpush3.bf16.msra.mxu1 %v6219_v44  ;;  %5794 = vmatprep.mubr.msk.f32.mxu1 %vm251_vm0, %v4916_v58  ;;  %v4957_v44 = vld [vmem:[%s8188_s3 + $0x368] sm:$0xff] }
 0x25c   :  { %6021 = vmatprep.mubr.msk.f32.mxu0 %vm251_vm0, %v5142_v59  ;;  %v4959_v59 = vld [vmem:[%s8188_s3 + $0x378] sm:$0xff] }
 0x25e   :  { %5795 = vmatmul.mubr.msk.f32.gmra.mrb[44].mxu1 %vm251_vm0, %v4917_v37  ;;  %6022 = vmatmul.mubr.msk.f32.gmra.mrb[30].mxu0 %vm251_vm0, %v5143_v46  ;;  %v5201_v37 = vld [vmem:[%s8188_s3 + $0x708] sm:$0xff]  ;;  %v5202_v46 = vld [vmem:[%s8188_s3 + $0x710] sm:$0xff] }
 0x25f   :  { %5797 = vmatprep.mubr.msk.f32.mxu1 %vm251_vm0, %v4918_v61  ;;  %6024 = vmatprep.mubr.msk.f32.mxu0 %vm251_vm0, %v5144_v30  ;;  %v5203_v30 = vld [vmem:[%s8188_s3 + $0x718] sm:$0xff] }
 0x262   :  { %5798 = vmatmul.mubr.msk.f32.gmra.mrb[46].mxu1 %vm251_vm0, %v4919_v40  ;;  %6025 = vmatmul.mubr.msk.f32.gmra.mrb[32].mxu0 %vm251_vm0, %v5145_v62  ;;  %v5204_v40 = vld [vmem:[%s8188_s3 + $0x720] sm:$0xff]  ;;  %v5205_v62 = vld [vmem:[%s8188_s3 + $0x728] sm:$0xff] }
 0x263   :  { %5800 = vmatprep.mubr.msk.f32.mxu1 %vm251_vm0, %v4920_v33  ;;  %6027 = vmatprep.mubr.msk.f32.mxu0 %vm251_vm0, %v5146_v51  ;;  %v5206_v33 = vld [vmem:[%s8188_s3 + $0x730] sm:$0xff]  ;;  %v5207_v51 = vld [vmem:[%s8188_s3 + $0x738] sm:$0xff] }
 0x266   :  { %5801 = vmatmul.mubr.msk.f32.gmra.mrb[48].mxu1 %vm251_vm0, %v4921_v1  ;;  %6028 = vmatmul.mubr.msk.f32.gmra.mrb[34].mxu0 %vm251_vm0, %v5147_v2  ;;  %v5208_v1 = vld [vmem:[%s8188_s3 + $0x740] sm:$0xff]  ;;  %v5209_v2 = vld [vmem:[%s8188_s3 + $0x748] sm:$0xff] }
 0x267   :  { %5803 = vmatprep.mubr.msk.f32.mxu1 %vm251_vm0, %v4922_v5  ;;  %6030 = vmatprep.mubr.msk.f32.mxu0 %vm251_vm0, %v5148_v6  ;;  %v5210_v5 = vld [vmem:[%s8188_s3 + $0x750] sm:$0xff]  ;;  %v5211_v6 = vld [vmem:[%s8188_s3 + $0x758] sm:$0xff] }
 0x26a   :  { %5804 = vmatmul.mubr.msk.f32.gmra.mrb[50].mxu1 %vm251_vm0, %v4923_v7  ;;  %6031 = vmatmul.mubr.msk.f32.gmra.mrb[36].mxu0 %vm251_vm0, %v5149_v10  ;;  %v5212_v7 = vld [vmem:[%s8188_s3 + $0x760] sm:$0xff]  ;;  %v5213_v10 = vld [vmem:[%s8188_s3 + $0x768] sm:$0xff] }
 0x26b   :  { %5806 = vmatprep.mubr.msk.f32.mxu1 %vm251_vm0, %v4924_v60  ;;  %6033 = vmatprep.mubr.msk.f32.mxu0 %vm251_vm0, %v5150_v12  ;;  %v5214_v60 = vld [vmem:[%s8188_s3 + $0x770] sm:$0xff]  ;;  %v5215_v12 = vld [vmem:[%s8188_s3 + $0x778] sm:$0xff] }
 0x26e   :  { %5807 = vmatmul.mubr.msk.f32.gmra.mrb[52].mxu1 %vm251_vm0, %v4925_v8  ;;  %6034 = vmatmul.mubr.msk.f32.gmra.mrb[38].mxu0 %vm251_vm0, %v5151_v56  ;;  %v5233_v8 = vld [vmem:[%s8188_s3 + $0x788] sm:$0xff]  ;;  %v5234_v56 = vld [vmem:[%s8188_s3 + $0x790] sm:$0xff] }
 0x26f   :  { %5809 = vmatprep.mubr.msk.f32.mxu1 %vm251_vm0, %v4926_v14  ;;  %6044 = vmatprep.mubr.msk.f32.mxu0 %vm251_vm0, %v5168_v15  ;;  %v5235_v14 = vld [vmem:[%s8188_s3 + $0x798] sm:$0xff]  ;;  %v5236_v15 = vld [vmem:[%s8188_s3 + $0x7a0] sm:$0xff] }
 0x272   :  { %5810 = vmatmul.mubr.msk.f32.gmra.mrb[54].mxu1 %vm251_vm0, %v4927_v3  ;;  %6045 = vmatmul.mubr.msk.f32.vlgmr.msra.gmra.mrb[24].mxu0 %vm251_vm0, %v5169_v11  ;;  %v5240_v3 = vld [vmem:[%s8188_s3 + $0x7c0] sm:$0xff]  ;;  %v5241_v11 = vld [vmem:[%s8188_s3 + $0x7c8] sm:$0xff] }
 0x273   :  { %6282 = vmatpush3.bf16.msra.mxu0 %v7775_v55  ;;  %5820 = vmatprep.mubr.msk.f32.mxu1 %vm251_vm0, %v4944_v20  ;;  %v6735_v55 = vpop.permute.xlu1 %6734  ;;  %v5242_v20 = vld [vmem:[%s8188_s3 + $0x7d0] sm:$0xff] }
 0x274   :  { %6284 = vmatprep.subr.bf16.mxu0 %v6283_v22  ;;  %6047 = vmatprep.mubr.msk.f32.mxu0 %vm251_vm0, %v5170_v21  ;;  %v6737_v28 = vunpack.i.h.bf16 %v6735_v55  ;;  %v6736_v58 = vunpack.i.l.bf16 %v6735_v55  ;;  %v5243_v21 = vld [vmem:[%s8188_s3 + $0x7d8] sm:$0xff] }
 0x276   :  { %5821 = vmatmul.mubr.msk.f32.vlgmr.msra.gmra.mrb[40].mxu1 %vm251_vm0, %v4945_v24  ;;  %6048 = vmatmul.mubr.msk.f32.gmra.mrb[26].mxu0 %vm251_vm0, %v5171_v26  ;;  %v6291_v61 = vpack.c.bf16 %v6737_v28, %v6736_v58  ;;  %v5247_v24 = vld [vmem:[%s8188_s3 + $0x7f8] sm:$0xff]  ;;  %v6756_v26 = vmov 0.0|0.0  }
 0x277   :  { %6286 = vmatpush3.bf16.msra.mxu0 %v6283_v22  ;;  %5823 = vmatprep.mubr.msk.f32.mxu1 %vm251_vm0, %v4946_v27  ;;  %v5244_v22 = vld [vmem:[%s8188_s3 + $0x7e0] sm:$0xff]  ;;  %v6758_v27 = vmov 0.0  }
 0x278   :  { %6288 = vmatprep.subr.bf16.mxu0 %v7914_v9  ;;  %6050 = vmatprep.mubr.msk.f32.mxu0 %vm251_vm0, %v5172_v63 }
 0x279   :  { %6295 = vmatprep.subr.bf16.mxu1 %v6756_v26 }
 0x27a   :  { %5824 = vmatmul.mubr.msk.f32.gmra.mrb[42].mxu1 %vm251_vm0, %v4947_v0  ;;  %6051 = vmatmul.mubr.msk.f32.gmra.mrb[28].mxu0 %vm251_vm0, %v5173_v31 }
 0x27b   :  { %5826 = vmatprep.mubr.msk.f32.mxu1 %vm251_vm0, %v4948_v32  ;;  %6053 = vmatprep.mubr.msk.f32.mxu0 %vm251_vm0, %v5174_v29 }
 0x27e   :  { %5827 = vmatmul.mubr.msk.f32.gmra.mrb[44].mxu1 %vm251_vm0, %v4949_v4  ;;  %6054 = vmatmul.mubr.msk.f32.gmra.mrb[30].mxu0 %vm251_vm0, %v5175_v34 }
 0x27f   :  { %5829 = vmatprep.mubr.msk.f32.mxu1 %vm251_vm0, %v4950_v36  ;;  %6056 = vmatprep.mubr.msk.f32.mxu0 %vm251_vm0, %v5176_v19 }
 0x282   :  { %5830 = vmatmul.mubr.msk.f32.gmra.mrb[46].mxu1 %vm251_vm0, %v4951_v38  ;;  %6057 = vmatmul.mubr.msk.f32.gmra.mrb[32].mxu0 %vm251_vm0, %v5177_v39 }
 0x283   :  { %5832 = vmatprep.mubr.msk.f32.mxu1 %vm251_vm0, %v4952_v41  ;;  %6059 = vmatprep.mubr.msk.f32.mxu0 %vm251_vm0, %v5178_v43 }
 0x286   :  { %5833 = vmatmul.mubr.msk.f32.gmra.mrb[48].mxu1 %vm251_vm0, %v4953_v45  ;;  %6060 = vmatmul.mubr.msk.f32.gmra.mrb[34].mxu0 %vm251_vm0, %v5179_v47 }
 0x287   :  { %5835 = vmatprep.mubr.msk.f32.mxu1 %vm251_vm0, %v4954_v54  ;;  %6062 = vmatprep.mubr.msk.f32.mxu0 %vm251_vm0, %v5180_v48 }
 0x28a   :  { %5836 = vmatmul.mubr.msk.f32.gmra.mrb[50].mxu1 %vm251_vm0, %v4955_v49  ;;  %6063 = vmatmul.mubr.msk.f32.gmra.mrb[36].mxu0 %vm251_vm0, %v5181_v50 }
 0x28b   :  { %5838 = vmatprep.mubr.msk.f32.mxu1 %vm251_vm0, %v4956_v52  ;;  %6065 = vmatprep.mubr.msk.f32.mxu0 %vm251_vm0, %v5182_v53 }
 0x28e   :  { %5839 = vmatmul.mubr.msk.f32.gmra.mrb[52].mxu1 %vm251_vm0, %v4957_v44  ;;  %6066 = vmatmul.mubr.msk.f32.gmra.mrb[38].mxu0 %vm251_vm0, %v5183_v23 }
 0x28f   :  { %5841 = vmatprep.mubr.msk.f32.mxu1 %vm251_vm0, %v4958_v57  ;;  %6076 = vmatprep.mubr.msk.f32.mxu0 %vm251_vm0, %v5200_v35 }
 0x292   :  { %5842 = vmatmul.mubr.msk.f32.gmra.mrb[54].mxu1 %vm251_vm0, %v4959_v59  ;;  %6077 = vmatmul.mubr.msk.f32.vlgmr.msra.gmra.mrb[24].mxu0 %vm251_vm0, %v5201_v37 }
 0x293   :  { %6290 = vmatpush3.bf16.msra.mxu0 %v7914_v9  ;;  %6079 = vmatprep.mubr.msk.f32.mxu0 %vm251_vm0, %v5202_v46 }
 0x294   :  { %6292 = vmatprep.subr.bf16.mxu0 %v6291_v61  ;;  %6164 = vmatprep.mubr.msk.f32.mxu1 %vm6757_vm1, %v6758_v27 }
 0x296   :  { %6080 = vmatmul.mubr.msk.f32.gmra.mrb[26].mxu0 %vm251_vm0, %v5203_v30 }
 0x297   :  { %6294 = vmatpush3.bf16.msra.mxu0 %v6291_v61  ;;  %6082 = vmatprep.mubr.msk.f32.mxu0 %vm251_vm0, %v5204_v40 }
 0x29a   :  { %6083 = vmatmul.mubr.msk.f32.gmra.mrb[28].mxu0 %vm251_vm0, %v5205_v62 }
 0x29b   :  { %6085 = vmatprep.mubr.msk.f32.mxu0 %vm251_vm0, %v5206_v33 }
 0x29e   :  { %6086 = vmatmul.mubr.msk.f32.gmra.mrb[30].mxu0 %vm251_vm0, %v5207_v51 }
 0x29f   :  { %6088 = vmatprep.mubr.msk.f32.mxu0 %vm251_vm0, %v5208_v1 }
 0x2a2   :  { %6089 = vmatmul.mubr.msk.f32.gmra.mrb[32].mxu0 %vm251_vm0, %v5209_v2 }
 0x2a3   :  { %6091 = vmatprep.mubr.msk.f32.mxu0 %vm251_vm0, %v5210_v5 }
 0x2a6   :  { %6092 = vmatmul.mubr.msk.f32.gmra.mrb[34].mxu0 %vm251_vm0, %v5211_v6 }
 0x2a7   :  { %6094 = vmatprep.mubr.msk.f32.mxu0 %vm251_vm0, %v5212_v7 }
 0x2aa   :  { %6095 = vmatmul.mubr.msk.f32.gmra.mrb[36].mxu0 %vm251_vm0, %v5213_v10 }
 0x2ab   :  { %6097 = vmatprep.mubr.msk.f32.mxu0 %vm251_vm0, %v5214_v60 }
 0x2ae   :  { %6098 = vmatmul.mubr.msk.f32.gmra.mrb[38].mxu0 %vm251_vm0, %v5215_v12 }
 0x2af   :  { %6108 = vmatprep.mubr.msk.f32.mxu0 %vm251_vm0, %v5232_v13 }
 0x2b2   :  { %6109 = vmatmul.mubr.msk.f32.vlgmr.msra.gmra.mrb[24].mxu0 %vm251_vm0, %v5233_v8 }
 0x2b3   :  { %6111 = vmatprep.mubr.msk.f32.mxu0 %vm251_vm0, %v5234_v56 }
 0x2b6   :  { %6112 = vmatmul.mubr.msk.f32.gmra.mrb[26].mxu0 %vm251_vm0, %v5235_v14 }
 0x2b7   :  { %6114 = vmatprep.mubr.msk.f32.mxu0 %vm251_vm0, %v5236_v15 }
 0x2ba   :  { %6115 = vmatmul.mubr.msk.f32.gmra.mrb[28].mxu0 %vm251_vm0, %v5237_v16 }
 0x2bb   :  { %6117 = vmatprep.mubr.msk.f32.mxu0 %vm251_vm0, %v5238_v17 }
 0x2be   :  { %6118 = vmatmul.mubr.msk.f32.gmra.mrb[30].mxu0 %vm251_vm0, %v5239_v18 }
 0x2bf   :  { %6120 = vmatprep.mubr.msk.f32.mxu0 %vm251_vm0, %v5240_v3 }
 0x2c2   :  { %6121 = vmatmul.mubr.msk.f32.gmra.mrb[32].mxu0 %vm251_vm0, %v5241_v11 }
 0x2c3   :  { %6123 = vmatprep.mubr.msk.f32.mxu0 %vm251_vm0, %v5242_v20 }
 0x2c6   :  { %6124 = vmatmul.mubr.msk.f32.gmra.mrb[34].mxu0 %vm251_vm0, %v5243_v21  ;;  %v4577_v21 = vlaneseq }
 0x2c7   :  { %6126 = vmatprep.mubr.msk.f32.mxu0 %vm251_vm0, %v5244_v22 }
 0x2c8   :  { %v4578_v22 = vshrl.u32 %v4577_v21, 7 }
 0x2ca   :  { %6127 = vmatmul.mubr.msk.f32.gmra.mrb[36].mxu0 %vm251_vm0, %v5245_v42  ;;  %v4580_v42 = vand.u32 127, %v4577_v21 }
 0x2cb   :  { %6129 = vmatprep.mubr.msk.f32.mxu0 %vm251_vm0, %v5246_v25 }
 0x2cc   :  { %vm4581_vm4 = vcmp.eq.s32.totalorder %v4578_v22, %v4580_v42 }
 0x2cd   :  { %v5264_v25 = vsel %vm4581_vm4, 1.0, %v6758_v27 }
 0x2ce   :  { %6130 = vmatmul.mubr.msk.f32.gmra.mrb[38].mxu0 %vm251_vm0, %v5247_v24  ;;  %v5265_v24 = vld [vmem:[%s8189_s4] ss:$0 sm:$0xff] }
 0x349   :  { %v5822_v63 = vpop.f32.mrb[40].mxu1 }
 0x34a   :  { %v2340_v9 = vpop.f32.mrb[41].mxu1 }
 0x34d   :  { %v5825_v0 = vpop.f32.mrb[42].mxu1 }
 0x34e   :  { %v2350_v31 = vpop.f32.mrb[43].mxu1 }
 0x351   :  { %v5828_v32 = vpop.f32.mrb[44].mxu1 }
 0x352   :  { %v2360_v29 = vpop.f32.mrb[45].mxu1 }
 0x355   :  { %v5831_v4 = vpop.f32.mrb[46].mxu1 }
 0x356   :  { %v2370_v34 = vpop.f32.mrb[47].mxu1 }
 0x359   :  { %v5834_v36 = vpop.f32.mrb[48].mxu1 }
 0x35a   :  { %v2380_v19 = vpop.f32.mrb[49].mxu1 }
 0x35d   :  { %v5837_v38 = vpop.f32.mrb[50].mxu1 }
 0x35e   :  { %v2390_v39 = vpop.f32.mrb[51].mxu1 }
 0x361   :  { %v5840_v41 = vpop.f32.mrb[52].mxu1 }
 0x362   :  { %v2400_v43 = vpop.f32.mrb[53].mxu1 }
 0x365   :  { %v5843_v45 = vpop.f32.mrb[54].mxu1 }
 0x366   :  { %v2410_v47 = vpop.f32.mrb[55].mxu1 }
 0x385   :  { %v6110_v54 = vpop.f32.mrb[24].mxu0 }
 0x386   :  { %v6327_v48 = vadd.f32 %v6110_v54, %v5822_v63  ;;  %v4482_v49 = vpop.f32.mrb[25].mxu0 }
 0x387   :  { %v6328_v50 = vadd.f32 %v4482_v49, %v2340_v9 }
 0x389   :  { %v6296_v53 = vpack.c.bf16 %v6327_v48, %v6328_v50  ;;  %v6113_v55 = vpop.f32.mrb[26].mxu0 }
 0x38a   :  { %v6329_v44 = vadd.f32 %v6113_v55, %v5825_v0  ;;  %v4492_v23 = vpop.f32.mrb[27].mxu0 }
 0x38b   :  { %v6330_v57 = vadd.f32 %v4492_v23, %v2350_v31  ;;  %6298 = vmatpush3.bf16.xpose.msk.msra.mxu1 %vm8150_vm3, %v6296_v53 }
 0x38c   :  { %6299 = vmatprep.subr.bf16.mxu1 %v6756_v26 }
 0x38d   :  { %v6300_v35 = vpack.c.bf16 %v6329_v44, %v6330_v57  ;;  %v6116_v28 = vpop.f32.mrb[28].mxu0 }
 0x38e   :  { %v6331_v58 = vadd.f32 %v6116_v28, %v5828_v32  ;;  %v4502_v59 = vpop.f32.mrb[29].mxu0 }
 0x38f   :  { %v6332_v37 = vadd.f32 %v4502_v59, %v2360_v29 }
 0x391   :  { %v6304_v46 = vpack.c.bf16 %v6331_v58, %v6332_v37  ;;  %v6119_v61 = vpop.f32.mrb[30].mxu0 }
 0x392   :  { %v6333_v30 = vadd.f32 %v6119_v61, %v5831_v4  ;;  %v4512_v40 = vpop.f32.mrb[31].mxu0 }
 0x393   :  { %v6334_v62 = vadd.f32 %v4512_v40, %v2370_v34  ;;  %6302 = vmatpush3.bf16.xpose.msk.msra.mxu1 %vm8150_vm3, %v6300_v35 }
 0x394   :  { %6303 = vmatprep.subr.bf16.mxu1 %v6756_v26 }
 0x395   :  { %v6308_v33 = vpack.c.bf16 %v6333_v30, %v6334_v62  ;;  %v6122_v51 = vpop.f32.mrb[32].mxu0 }
 0x396   :  { %v6335_v1 = vadd.f32 %v6122_v51, %v5834_v36  ;;  %v4522_v2 = vpop.f32.mrb[33].mxu0 }
 0x397   :  { %v6336_v5 = vadd.f32 %v4522_v2, %v2380_v19 }
 0x399   :  { %v6312_v6 = vpack.c.bf16 %v6335_v1, %v6336_v5  ;;  %v6125_v7 = vpop.f32.mrb[34].mxu0 }
 0x39a   :  { %v6337_v10 = vadd.f32 %v6125_v7, %v5837_v38  ;;  %v4532_v60 = vpop.f32.mrb[35].mxu0 }
 0x39b   :  { %v6338_v12 = vadd.f32 %v4532_v60, %v2390_v39  ;;  %6306 = vmatpush3.bf16.xpose.msk.msra.mxu1 %vm8150_vm3, %v6304_v46 }
 0x39c   :  { %6307 = vmatprep.subr.bf16.mxu1 %v6756_v26 }
 0x39d   :  { %v6316_v13 = vpack.c.bf16 %v6337_v10, %v6338_v12  ;;  %v6128_v8 = vpop.f32.mrb[36].mxu0 }
 0x39e   :  { %v6339_v56 = vadd.f32 %v6128_v8, %v5840_v41  ;;  %v4542_v14 = vpop.f32.mrb[37].mxu0 }
 0x39f   :  { %v6340_v15 = vadd.f32 %v4542_v14, %v2400_v43 }
 0x3a1   :  { %v6320_v16 = vpack.c.bf16 %v6339_v56, %v6340_v15  ;;  %v6131_v17 = vpop.f32.mrb[38].mxu0 }
 0x3a2   :  { %v6341_v18 = vadd.f32 %v6131_v17, %v5843_v45  ;;  %v4552_v3 = vpop.f32.mrb[39].mxu0 }
 0x3a3   :  { %v6342_v11 = vadd.f32 %v4552_v3, %v2410_v47  ;;  %6310 = vmatpush3.bf16.xpose.msk.msra.mxu1 %vm8150_vm3, %v6308_v33 }
 0x3a4   :  { %6311 = vmatprep.subr.bf16.mxu1 %v6756_v26 }
 0x3a5   :  { %v6324_v20 = vpack.c.bf16 %v6341_v18, %v6342_v11 }
 0x3ab   :  { %6314 = vmatpush3.bf16.xpose.msk.msra.mxu1 %vm8150_vm3, %v6312_v6 }
 0x3ac   :  { %6315 = vmatprep.subr.bf16.mxu1 %v6756_v26 }
 0x3b3   :  { %6318 = vmatpush3.bf16.xpose.msk.msra.mxu1 %vm8150_vm3, %v6316_v13 }
 0x3b4   :  { %6319 = vmatprep.subr.bf16.mxu1 %v6756_v26 }
 0x3bb   :  { %6322 = vmatpush3.bf16.xpose.msk.msra.mxu1 %vm8150_vm3, %v6320_v16 }
 0x3bc   :  { %6323 = vmatprep.subr.bf16.mxu1 %v6756_v26 }
 0x3c3   :  { %6326 = vmatpush3.bf16.xpose.msk.msra.mxu1 %vm8150_vm3, %v6324_v20 }
 0x3ca   :  { %6165 = vmatmul.mubr.msk.f32.vlgmr.msra.gmra.mrb[56].mxu1 %vm4591_vm2, %v5264_v25 }
 0x49d   :  { %v4709_v63 = vpop.f32.mrb[56].mxu1 }
 0x49e   :  { %v4710_v9 = vadd.f32 %v5265_v24, %v4709_v63  ;;  %v6166_v0 = vpop.f32.mrb[57].mxu1 }
 0x4a0   :  { %4713 = vst [vmem:[%s8190_s5] sm:$0xff] %v4710_v9 }

</bundles_post_ra>
